<compile_context>
chip_gen: v5e
topology: v5e:2x2
jax: 0.10.0
libtpu: 0.0.40
codegen_flags: <defaults>
</compile_context>

<pallas_src>
import math

import jax
import jax.numpy as jnp
from jax.experimental import pallas as pl
from jax.experimental.pallas import tpu as pltpu

# ----------------------- config (small synthetic BERT) -----------------------
VOCAB = 50
HIDDEN = 32
N_HEADS = 2
HEAD_DIM = HIDDEN // N_HEADS
INTERMEDIATE = 64
N_LAYERS = 2
MAX_POS = 32
TYPE_VOCAB = 2
NUM_CLASSES = 2
CLS_PAD = 128          # lane-dense padded classifier width
LN_EPS = 1e-12


# ------------------------------ fused kernel ---------------------------------
def _bert_fused_kernel(
    emb_ref,      # [1, M, H]  f32   pre-summed word+pos+type embeddings (slab)
    bias_ref,     # [1, M, M]  f32   block-diagonal additive attention bias
    emb_ln_ref,   # [2, 1, H]  f32   embedding LayerNorm gamma / beta
    wqkv_ref,     # [L*3*nH, H, Dh] bf16  per-head Q/K/V weights (Q pre-scaled)
    bqkv_ref,     # [L*3*nH, 1, Dh] f32   per-head Q/K/V biases  (Q pre-scaled)
    wo_ref,       # [L*nH, Dh, H]   bf16  per-head output-projection weights
    w1_ref,       # [L, H, I]       bf16  FFN up
    w2_ref,       # [L, I, H]       bf16  FFN down
    b1_ref,       # [L, 1, I]       f32
    vecs_ref,     # [L*6, 1, H]     f32   [bo, ln1_g, ln1_b, b2, ln2_g, ln2_b] / layer
    cls_w_ref,    # [H, CLS_PAD]    bf16  lane-padded classifier weight
    cls_b_ref,    # [1, CLS_PAD]    f32
    o_ref,        # [1, M, CLS_PAD] f32   output block
):
    _, M, H = emb_ref.shape
    nH, Dh = N_HEADS, HEAD_DIM

    def ln(x, g, b):
        # f32 elementwise LayerNorm (matches HF BERT eps=1e-12)
        mean = jnp.mean(x, axis=-1, keepdims=True)
        var = jnp.mean((x - mean) ** 2, axis=-1, keepdims=True)
        return (x - mean) * jax.lax.rsqrt(var + LN_EPS) * g + b

    def mm(a, w_bf16):
        # bf16 MXU inputs (weight already bf16 host-side), f32 accumulation
        return jnp.dot(a.astype(jnp.bfloat16), w_bf16,
                       preferred_element_type=jnp.float32)

    # --- embedding LayerNorm on the pre-summed slab ---
    x = ln(emb_ref[0], emb_ln_ref[0], emb_ln_ref[1])          # [M, H]
    bias = bias_ref[0]                                        # [M, M], hoisted once

    # --- transformer layers (unrolled; weights indexed by static ids) ---
    for li in range(N_LAYERS):
        # Multi-head self-attention with per-head weights; the output projection
        # is accumulated per head (no lane slicing / concat of activations).
        attn = None
        for h in range(nH):
            iq = (li * 3 + 0) * nH + h
            ik = (li * 3 + 1) * nH + h
            iv = (li * 3 + 2) * nH + h
            qh = mm(x, wqkv_ref[iq]) + bqkv_ref[iq]           # [M, Dh] (scale folded)
            kh = mm(x, wqkv_ref[ik]) + bqkv_ref[ik]           # [M, Dh]
            vh = mm(x, wqkv_ref[iv]) + bqkv_ref[iv]           # [M, Dh]

            s = jax.lax.dot_general(
                qh.astype(jnp.bfloat16), kh.astype(jnp.bfloat16),
                dimension_numbers=(((1,), (1,)), ((), ())),
                preferred_element_type=jnp.float32) + bias    # [M, M]
            s = s - jnp.max(s, axis=-1, keepdims=True)
            p = jnp.exp(s)
            p = p * pl.reciprocal(jnp.sum(p, axis=-1, keepdims=True), approx=True)

            ctx = mm(p, vh.astype(jnp.bfloat16))              # [M, Dh]
            contrib = mm(ctx, wo_ref[li * nH + h])            # [M, H]
            attn = contrib if attn is None else attn + contrib

        v0 = li * 6
        attn = attn + vecs_ref[v0 + 0]                        # bo
        x = ln(attn + x, vecs_ref[v0 + 1], vecs_ref[v0 + 2])  # post-attention LN

        # FFN: dense -> GELU -> dense + residual + LayerNorm
        h1 = mm(x, w1_ref[li]) + b1_ref[li]                   # [M, I]
        # TODO(synk): HF BERT default act is exact erf-GELU; tanh approximation used here.
        c = math.sqrt(2.0 / math.pi)
        h1 = 0.5 * h1 * (1.0 + jnp.tanh(c * (h1 + 0.044715 * h1 * h1 * h1)))
        ffn = mm(h1, w2_ref[li]) + vecs_ref[v0 + 3]           # b2
        x = ln(ffn + x, vecs_ref[v0 + 4], vecs_ref[v0 + 5])   # post-FFN LN

    # --- classifier into a lane-dense, zero-padded [M, CLS_PAD] slab ---
    logits = mm(x, cls_w_ref[...]) + cls_b_ref[...]           # [M, CLS_PAD]
    o_ref[...] = logits.reshape(1, M, CLS_PAD).astype(o_ref.dtype)


# ------------------------------- params / glue --------------------------------
def init_params(key):
    def nrm(k, shape):
        return jax.random.normal(k, shape, jnp.float32) * 0.02

    ks = jax.random.split(key, 8)
    L, H, I = N_LAYERS, HIDDEN, INTERMEDIATE
    return {
        "word_emb": nrm(ks[0], (VOCAB, H)),
        "pos_emb": nrm(ks[1], (MAX_POS, H)),
        "tok_emb": nrm(ks[2], (TYPE_VOCAB, H)),
        "emb_ln_g": jnp.ones((1, H), jnp.float32),
        "emb_ln_b": jnp.zeros((1, H), jnp.float32),
        "wqkv": nrm(ks[3], (L, H, 3 * H)),          # fused layout: [Q | K | V], heads along cols
        "bqkv": jnp.zeros((L, 1, 3 * H), jnp.float32),
        "wo": nrm(ks[4], (L, H, H)),
        "bo": jnp.zeros((L, 1, H), jnp.float32),
        "attn_ln_g": jnp.ones((L, 1, H), jnp.float32),
        "attn_ln_b": jnp.zeros((L, 1, H), jnp.float32),
        "w1": nrm(ks[5], (L, H, I)),
        "b1": jnp.zeros((L, 1, I), jnp.float32),
        "w2": nrm(ks[6], (L, I, H)),
        "b2": jnp.zeros((L, 1, H), jnp.float32),
        "ffn_ln_g": jnp.ones((L, 1, H), jnp.float32),
        "ffn_ln_b": jnp.zeros((L, 1, H), jnp.float32),
        "cls_w": nrm(ks[7], (H, NUM_CLASSES)),
        "cls_b": jnp.zeros((1, NUM_CLASSES), jnp.float32),
    }


def pack_params(params):
    """Host-side, one-time weight repacking: per-head layouts, bf16 casts,
    1/sqrt(Dh) folded into Q, small per-layer vectors stacked into one array."""
    L, H, nH, Dh = N_LAYERS, HIDDEN, N_HEADS, HEAD_DIM
    scale = 1.0 / math.sqrt(Dh)

    # [L, H, 3H] -> [L, 3, nH, H, Dh] (and biases likewise), fold scale into Q
    wqkv = params["wqkv"].reshape(L, H, 3, nH, Dh).transpose(0, 2, 3, 1, 4)
    bqkv = params["bqkv"].reshape(L, 1, 3, nH, Dh).transpose(0, 2, 3, 1, 4)
    wqkv = wqkv.at[:, 0].multiply(scale)
    bqkv = bqkv.at[:, 0].multiply(scale)

    vecs = jnp.stack([params["bo"], params["attn_ln_g"], params["attn_ln_b"],
                      params["b2"], params["ffn_ln_g"], params["ffn_ln_b"]],
                     axis=1)                                   # [L, 6, 1, H]

    cls_w_pad = jnp.zeros((H, CLS_PAD), jnp.float32).at[:, :NUM_CLASSES].set(params["cls_w"])
    cls_b_pad = jnp.zeros((1, CLS_PAD), jnp.float32).at[:, :NUM_CLASSES].set(params["cls_b"])

    return {
        "word_emb": params["word_emb"],
        "pos_emb": params["pos_emb"],
        "tok_emb": params["tok_emb"],
        "emb_ln": jnp.stack([params["emb_ln_g"], params["emb_ln_b"]], axis=0),  # [2,1,H]
        "wqkv_h": wqkv.reshape(L * 3 * nH, H, Dh).astype(jnp.bfloat16),
        "bqkv_h": bqkv.reshape(L * 3 * nH, 1, Dh),
        "wo_h": params["wo"].reshape(L, nH, Dh, H).reshape(L * nH, Dh, H).astype(jnp.bfloat16),
        "w1": params["w1"].astype(jnp.bfloat16),
        "w2": params["w2"].astype(jnp.bfloat16),
        "b1": params["b1"],
        "vecs": vecs.reshape(L * 6, 1, H),
        "cls_w": cls_w_pad.astype(jnp.bfloat16),
        "cls_b": cls_b_pad,
    }


def bert_for_token_classification(packed, input_ids, input_mask, segment_ids):
    B, S = input_ids.shape
    H, I, L, nH = HIDDEN, INTERMEDIATE, N_LAYERS, N_HEADS

    # Grid sizing: keep >=2 steps when B >= 2 so both v7x TensorCores get work;
    # each step processes a slab of B_blk sequences so dense matmuls see M rows.
    n_steps = 2 if B >= 2 else 1
    B_blk = -(-B // n_steps)
    Bp = n_steps * B_blk
    M = B_blk * S

    # TODO(synk): data-dependent embedding gathers done with jnp.take outside the
    # kernel; at real vocab scale these would move in-kernel via scalar-prefetched
    # ids + pl.Element row gathers.
    emb = (jnp.take(packed["word_emb"], input_ids, axis=0)
           + jnp.take(packed["tok_emb"], segment_ids, axis=0)
           + packed["pos_emb"][:S][None, :, :])                       # [B, S, H] f32

    mask = input_mask
    if Bp > B:
        emb = jnp.pad(emb, ((0, Bp - B), (0, 0), (0, 0)))
        mask = jnp.pad(mask, ((0, Bp - B), (0, 0)))
    emb = emb.reshape(n_steps, M, H)

    # Block-diagonal additive attention bias (built once; hoisted inside kernel):
    #   0       same-sequence, non-padded key      (HF convention)
    #  -10000   same-sequence, padded key          (HF convention)
    #  -30000   across different sequences in the slab (exp underflows to exactly 0)
    seq_id = jnp.arange(M) // S
    same = (seq_id[:, None] == seq_id[None, :])[None, :, :]           # [1, M, M]
    key_pad = 1.0 - mask.astype(jnp.float32).reshape(n_steps, M)      # [G, M]
    attn_bias = jnp.where(same, key_pad[:, None, :] * -10000.0, -30000.0)  # [G, M, M]

    weight_args = (
        packed["emb_ln"], packed["wqkv_h"], packed["bqkv_h"], packed["wo_h"],
        packed["w1"], packed["w2"], packed["b1"], packed["vecs"],
        packed["cls_w"], packed["cls_b"],
    )

    # TODO(synk): at real BERT scale (H=768+, 12-24 layers) replace the
    # replicate-all-layers-resident scheme with a per-layer pipelined grid axis
    # (pltpu.emit_pipeline / Buffered(2)) and set vmem_limit_bytes — v7x has only
    # 64 MiB physical VMEM. At these toy shapes (<1 MiB of weights) it is fine.
    def _rep_spec(shape):
        nd = len(shape)
        return pl.BlockSpec(tuple(shape), lambda g: (0,) * nd)

    in_specs = [
        pl.BlockSpec((1, M, H), lambda g: (g, 0, 0)),        # emb slab
        pl.BlockSpec((1, M, M), lambda g: (g, 0, 0)),        # attention bias
    ] + [_rep_spec(w.shape) for w in weight_args]

    # Advisory cost estimate so XLA can overlap the gathers / mask prep around the call.
    flops = n_steps * M * (L * (8 * H * H + 4 * H * M + 4 * H * I) + 2 * H * CLS_PAD)
    transcendentals = n_steps * M * L * (nH * M + I)
    bytes_accessed = (int(emb.size) * 4 + int(attn_bias.size) * 4
                      + sum(int(w.size) * int(w.dtype.itemsize) for w in weight_args) * n_steps
                      + n_steps * M * CLS_PAD * 4)

    out_padded = pl.pallas_call(
        _bert_fused_kernel,
        out_shape=jax.ShapeDtypeStruct((n_steps, M, CLS_PAD), jnp.float32),
        grid=(n_steps,),
        in_specs=in_specs,
        out_specs=pl.BlockSpec((1, M, CLS_PAD), lambda g: (g, 0, 0)),
        compiler_params=pltpu.CompilerParams(dimension_semantics=("parallel",)),
        cost_estimate=pl.CostEstimate(flops=int(flops),
                                      transcendentals=int(transcendentals),
                                      bytes_accessed=int(bytes_accessed)),
    )(emb, attn_bias, *weight_args)

    # Dropout(0.5) is identity in eval; un-pad the batch and slice the lane-padded
    # logits back to NUM_CLASSES.
    return out_padded.reshape(Bp, S, CLS_PAD)[:B, :, :NUM_CLASSES]


# ----------------------------------- main -------------------------------------
if __name__ == "__main__":
    B, S = 2, 8
    key = jax.random.PRNGKey(0)
    k_param, k_ids, k_seg = jax.random.split(key, 3)

    params = init_params(k_param)
    packed = pack_params(params)          # one-time host-side repack / bf16 cast

    input_ids = jax.random.randint(k_ids, (B, S), 0, VOCAB, dtype=jnp.int32)
    input_mask = jnp.array([[1, 1, 1, 1, 1, 1, 1, 1],
                            [1, 1, 1, 1, 1, 1, 0, 0]], dtype=jnp.int32)
    segment_ids = jnp.array([[0, 0, 0, 0, 1, 1, 1, 1],
                             [0, 0, 0, 1, 1, 1, 0, 0]], dtype=jnp.int32)

    fwd = jax.jit(bert_for_token_classification)
    logits = fwd(packed, input_ids, input_mask, segment_ids)
    jax.block_until_ready(logits)

    assert logits.shape == (B, S, NUM_CLASSES)
    assert bool(jnp.all(jnp.isfinite(logits)))
    print("KERNEL_OK")
</pallas_src>

<mosaic_0001>
module attributes {stable_mosaic.version = 11 : i64} {
  func.func @_bert_fused_kernel(%arg0: i32, %arg1: memref<1x8x32xf32, #tpu.memory_space<vmem>>, %arg2: memref<1x8x8xf32, #tpu.memory_space<vmem>>, %arg3: memref<2x1x32xf32, #tpu.memory_space<vmem>>, %arg4: memref<12x32x16xbf16, #tpu.memory_space<vmem>>, %arg5: memref<12x1x16xf32, #tpu.memory_space<vmem>>, %arg6: memref<4x16x32xbf16, #tpu.memory_space<vmem>>, %arg7: memref<2x32x64xbf16, #tpu.memory_space<vmem>>, %arg8: memref<2x64x32xbf16, #tpu.memory_space<vmem>>, %arg9: memref<2x1x64xf32, #tpu.memory_space<vmem>>, %arg10: memref<12x1x32xf32, #tpu.memory_space<vmem>>, %arg11: memref<32x128xbf16, #tpu.memory_space<vmem>>, %arg12: memref<1x128xf32, #tpu.memory_space<vmem>>, %arg13: memref<1x8x128xf32, #tpu.memory_space<vmem>>) attributes {dimension_semantics = [#tpu.dimension_semantics<parallel>], iteration_bounds = array<i64: 2>, scalar_prefetch = 0 : i64, scratch_operands = 0 : i64, tpu.core_type = #tpu.core_type<tc>, window_params = [{transform_indices = @transform_0, window_bounds = array<i64: 1, 8, 32>}, {transform_indices = @transform_1, window_bounds = array<i64: 1, 8, 8>}, {pipeline_mode = #tpu.pipeline_mode<synchronous>, transform_indices = @transform_2, window_bounds = array<i64: 2, 1, 32>}, {pipeline_mode = #tpu.pipeline_mode<synchronous>, transform_indices = @transform_3, window_bounds = array<i64: 12, 32, 16>}, {pipeline_mode = #tpu.pipeline_mode<synchronous>, transform_indices = @transform_4, window_bounds = array<i64: 12, 1, 16>}, {pipeline_mode = #tpu.pipeline_mode<synchronous>, transform_indices = @transform_5, window_bounds = array<i64: 4, 16, 32>}, {pipeline_mode = #tpu.pipeline_mode<synchronous>, transform_indices = @transform_6, window_bounds = array<i64: 2, 32, 64>}, {pipeline_mode = #tpu.pipeline_mode<synchronous>, transform_indices = @transform_7, window_bounds = array<i64: 2, 64, 32>}, {pipeline_mode = #tpu.pipeline_mode<synchronous>, transform_indices = @transform_8, window_bounds = array<i64: 2, 1, 64>}, {pipeline_mode = #tpu.pipeline_mode<synchronous>, transform_indices = @transform_9, window_bounds = array<i64: 12, 1, 32>}, {pipeline_mode = #tpu.pipeline_mode<synchronous>, transform_indices = @transform_10, window_bounds = array<i64: 32, 128>}, {pipeline_mode = #tpu.pipeline_mode<synchronous>, transform_indices = @transform_11, window_bounds = array<i64: 1, 128>}, {transform_indices = @transform_12, window_bounds = array<i64: 1, 8, 128>}]} {
    %c0 = arith.constant 0 : index
    %c0_0 = arith.constant 0 : index
    %c0_1 = arith.constant 0 : index
    %0 = vector.load %arg1[%c0, %c0_0, %c0_1] : memref<1x8x32xf32, #tpu.memory_space<vmem>>, vector<1x8x32xf32>
    %1 = vector.shape_cast %0 : vector<1x8x32xf32> to vector<8x32xf32>
    %c0_2 = arith.constant 0 : index
    %c0_3 = arith.constant 0 : index
    %c0_4 = arith.constant 0 : index
    %2 = vector.load %arg3[%c0_2, %c0_3, %c0_4] : memref<2x1x32xf32, #tpu.memory_space<vmem>>, vector<1x1x32xf32>
    %3 = vector.shape_cast %2 : vector<1x1x32xf32> to vector<1x32xf32>
    %c1 = arith.constant 1 : index
    %c0_5 = arith.constant 0 : index
    %c0_6 = arith.constant 0 : index
    %4 = vector.load %arg3[%c1, %c0_5, %c0_6] : memref<2x1x32xf32, #tpu.memory_space<vmem>>, vector<1x1x32xf32>
    %5 = vector.shape_cast %4 : vector<1x1x32xf32> to vector<1x32xf32>
    %cst = arith.constant dense<0.000000e+00> : vector<8xf32>
    %6 = vector.multi_reduction <add>, %1, %cst [1] : vector<8x32xf32> to vector<8xf32>
    %7 = vector.shape_cast %6 : vector<8xf32> to vector<8x1xf32>
    %cst_7 = arith.constant 3.200000e+01 : f32
    %8 = vector.broadcast %cst_7 : f32 to vector<8x1xf32>
    %9 = arith.divf %7, %8 : vector<8x1xf32>
    %10 = vector.broadcast %9 : vector<8x1xf32> to vector<8x32xf32>
    %11 = arith.subf %1, %10 : vector<8x32xf32>
    %12 = arith.mulf %11, %11 : vector<8x32xf32>
    %cst_8 = arith.constant dense<0.000000e+00> : vector<8xf32>
    %13 = vector.multi_reduction <add>, %12, %cst_8 [1] : vector<8x32xf32> to vector<8xf32>
    %14 = vector.shape_cast %13 : vector<8xf32> to vector<8x1xf32>
    %cst_9 = arith.constant 3.200000e+01 : f32
    %15 = vector.broadcast %cst_9 : f32 to vector<8x1xf32>
    %16 = arith.divf %14, %15 : vector<8x1xf32>
    %17 = vector.broadcast %9 : vector<8x1xf32> to vector<8x32xf32>
    %18 = arith.subf %1, %17 : vector<8x32xf32>
    %cst_10 = arith.constant 9.99999996E-13 : f32
    %19 = vector.broadcast %cst_10 : f32 to vector<8x1xf32>
    %20 = arith.addf %16, %19 : vector<8x1xf32>
    %21 = math.rsqrt %20 : vector<8x1xf32>
    %22 = vector.broadcast %21 : vector<8x1xf32> to vector<8x32xf32>
    %23 = arith.mulf %18, %22 : vector<8x32xf32>
    %24 = vector.broadcast %3 : vector<1x32xf32> to vector<8x32xf32>
    %25 = arith.mulf %23, %24 : vector<8x32xf32>
    %26 = vector.broadcast %5 : vector<1x32xf32> to vector<8x32xf32>
    %27 = arith.addf %25, %26 : vector<8x32xf32>
    %c0_11 = arith.constant 0 : index
    %c0_12 = arith.constant 0 : index
    %c0_13 = arith.constant 0 : index
    %28 = vector.load %arg2[%c0_11, %c0_12, %c0_13] : memref<1x8x8xf32, #tpu.memory_space<vmem>>, vector<1x8x8xf32>
    %29 = vector.shape_cast %28 : vector<1x8x8xf32> to vector<8x8xf32>
    %c0_14 = arith.constant 0 : index
    %c0_15 = arith.constant 0 : index
    %c0_16 = arith.constant 0 : index
    %30 = vector.load %arg4[%c0_14, %c0_15, %c0_16] : memref<12x32x16xbf16, #tpu.memory_space<vmem>>, vector<1x32x16xbf16>
    %31 = vector.shape_cast %30 : vector<1x32x16xbf16> to vector<32x16xbf16>
    %32 = arith.truncf %27 : vector<8x32xf32> to vector<8x32xbf16>
    %cst_17 = arith.constant dense<0.000000e+00> : vector<8x16xf32>
    %33 = tpu.matmul %32, %31, %cst_17 {dimension_numbers = #tpu.dot_dimension_numbers<[1], [0], [0], [1], [0, 0, 1, 1], [], []>} : vector<8x32xbf16>, vector<32x16xbf16>, vector<8x16xf32> -> vector<8x16xf32>
    %c0_18 = arith.constant 0 : index
    %c0_19 = arith.constant 0 : index
    %c0_20 = arith.constant 0 : index
    %34 = vector.load %arg5[%c0_18, %c0_19, %c0_20] : memref<12x1x16xf32, #tpu.memory_space<vmem>>, vector<1x1x16xf32>
    %35 = vector.shape_cast %34 : vector<1x1x16xf32> to vector<1x16xf32>
    %36 = vector.broadcast %35 : vector<1x16xf32> to vector<8x16xf32>
    %37 = arith.addf %33, %36 : vector<8x16xf32>
    %c2 = arith.constant 2 : index
    %c0_21 = arith.constant 0 : index
    %c0_22 = arith.constant 0 : index
    %38 = vector.load %arg4[%c2, %c0_21, %c0_22] : memref<12x32x16xbf16, #tpu.memory_space<vmem>>, vector<1x32x16xbf16>
    %39 = vector.shape_cast %38 : vector<1x32x16xbf16> to vector<32x16xbf16>
    %40 = arith.truncf %27 : vector<8x32xf32> to vector<8x32xbf16>
    %cst_23 = arith.constant dense<0.000000e+00> : vector<8x16xf32>
    %41 = tpu.matmul %40, %39, %cst_23 {dimension_numbers = #tpu.dot_dimension_numbers<[1], [0], [0], [1], [0, 0, 1, 1], [], []>} : vector<8x32xbf16>, vector<32x16xbf16>, vector<8x16xf32> -> vector<8x16xf32>
    %c2_24 = arith.constant 2 : index
    %c0_25 = arith.constant 0 : index
    %c0_26 = arith.constant 0 : index
    %42 = vector.load %arg5[%c2_24, %c0_25, %c0_26] : memref<12x1x16xf32, #tpu.memory_space<vmem>>, vector<1x1x16xf32>
    %43 = vector.shape_cast %42 : vector<1x1x16xf32> to vector<1x16xf32>
    %44 = vector.broadcast %43 : vector<1x16xf32> to vector<8x16xf32>
    %45 = arith.addf %41, %44 : vector<8x16xf32>
    %c4 = arith.constant 4 : index
    %c0_27 = arith.constant 0 : index
    %c0_28 = arith.constant 0 : index
    %46 = vector.load %arg4[%c4, %c0_27, %c0_28] : memref<12x32x16xbf16, #tpu.memory_space<vmem>>, vector<1x32x16xbf16>
    %47 = vector.shape_cast %46 : vector<1x32x16xbf16> to vector<32x16xbf16>
    %48 = arith.truncf %27 : vector<8x32xf32> to vector<8x32xbf16>
    %cst_29 = arith.constant dense<0.000000e+00> : vector<8x16xf32>
    %49 = tpu.matmul %48, %47, %cst_29 {dimension_numbers = #tpu.dot_dimension_numbers<[1], [0], [0], [1], [0, 0, 1, 1], [], []>} : vector<8x32xbf16>, vector<32x16xbf16>, vector<8x16xf32> -> vector<8x16xf32>
    %c4_30 = arith.constant 4 : index
    %c0_31 = arith.constant 0 : index
    %c0_32 = arith.constant 0 : index
    %50 = vector.load %arg5[%c4_30, %c0_31, %c0_32] : memref<12x1x16xf32, #tpu.memory_space<vmem>>, vector<1x1x16xf32>
    %51 = vector.shape_cast %50 : vector<1x1x16xf32> to vector<1x16xf32>
    %52 = vector.broadcast %51 : vector<1x16xf32> to vector<8x16xf32>
    %53 = arith.addf %49, %52 : vector<8x16xf32>
    %54 = arith.truncf %37 : vector<8x16xf32> to vector<8x16xbf16>
    %55 = arith.truncf %45 : vector<8x16xf32> to vector<8x16xbf16>
    %cst_33 = arith.constant dense<0.000000e+00> : vector<8x8xf32>
    %56 = tpu.matmul %54, %55, %cst_33 {dimension_numbers = #tpu.dot_dimension_numbers<[1], [1], [0], [0], [0, 0, 1, 0], [], []>} : vector<8x16xbf16>, vector<8x16xbf16>, vector<8x8xf32> -> vector<8x8xf32>
    %57 = arith.addf %56, %29 : vector<8x8xf32>
    %cst_34 = arith.constant dense<0xFF800000> : vector<8xf32>
    %58 = vector.multi_reduction <maximumf>, %57, %cst_34 [1] : vector<8x8xf32> to vector<8xf32>
    %59 = vector.shape_cast %58 : vector<8xf32> to vector<8x1xf32>
    %60 = vector.broadcast %59 : vector<8x1xf32> to vector<8x8xf32>
    %61 = arith.subf %57, %60 : vector<8x8xf32>
    %62 = math.exp %61 : vector<8x8xf32>
    %cst_35 = arith.constant dense<0.000000e+00> : vector<8xf32>
    %63 = vector.multi_reduction <add>, %62, %cst_35 [1] : vector<8x8xf32> to vector<8xf32>
    %64 = vector.shape_cast %63 : vector<8xf32> to vector<8x1xf32>
    %65 = tpu.reciprocal %64 {approx = true} : vector<8x1xf32> -> vector<8x1xf32>
    %66 = vector.broadcast %65 : vector<8x1xf32> to vector<8x8xf32>
    %67 = arith.mulf %62, %66 : vector<8x8xf32>
    %68 = arith.truncf %53 : vector<8x16xf32> to vector<8x16xbf16>
    %69 = arith.truncf %67 : vector<8x8xf32> to vector<8x8xbf16>
    %cst_36 = arith.constant dense<0.000000e+00> : vector<8x16xf32>
    %70 = tpu.matmul %69, %68, %cst_36 {dimension_numbers = #tpu.dot_dimension_numbers<[1], [0], [0], [1], [0, 0, 1, 1], [], []>} : vector<8x8xbf16>, vector<8x16xbf16>, vector<8x16xf32> -> vector<8x16xf32>
    %c0_37 = arith.constant 0 : index
    %c0_38 = arith.constant 0 : index
    %c0_39 = arith.constant 0 : index
    %71 = vector.load %arg6[%c0_37, %c0_38, %c0_39] : memref<4x16x32xbf16, #tpu.memory_space<vmem>>, vector<1x16x32xbf16>
    %72 = vector.shape_cast %71 : vector<1x16x32xbf16> to vector<16x32xbf16>
    %73 = arith.truncf %70 : vector<8x16xf32> to vector<8x16xbf16>
    %cst_40 = arith.constant dense<0.000000e+00> : vector<8x32xf32>
    %74 = tpu.matmul %73, %72, %cst_40 {dimension_numbers = #tpu.dot_dimension_numbers<[1], [0], [0], [1], [0, 0, 1, 1], [], []>} : vector<8x16xbf16>, vector<16x32xbf16>, vector<8x32xf32> -> vector<8x32xf32>
    %c1_41 = arith.constant 1 : index
    %c0_42 = arith.constant 0 : index
    %c0_43 = arith.constant 0 : index
    %75 = vector.load %arg4[%c1_41, %c0_42, %c0_43] : memref<12x32x16xbf16, #tpu.memory_space<vmem>>, vector<1x32x16xbf16>
    %76 = vector.shape_cast %75 : vector<1x32x16xbf16> to vector<32x16xbf16>
    %77 = arith.truncf %27 : vector<8x32xf32> to vector<8x32xbf16>
    %cst_44 = arith.constant dense<0.000000e+00> : vector<8x16xf32>
    %78 = tpu.matmul %77, %76, %cst_44 {dimension_numbers = #tpu.dot_dimension_numbers<[1], [0], [0], [1], [0, 0, 1, 1], [], []>} : vector<8x32xbf16>, vector<32x16xbf16>, vector<8x16xf32> -> vector<8x16xf32>
    %c1_45 = arith.constant 1 : index
    %c0_46 = arith.constant 0 : index
    %c0_47 = arith.constant 0 : index
    %79 = vector.load %arg5[%c1_45, %c0_46, %c0_47] : memref<12x1x16xf32, #tpu.memory_space<vmem>>, vector<1x1x16xf32>
    %80 = vector.shape_cast %79 : vector<1x1x16xf32> to vector<1x16xf32>
    %81 = vector.broadcast %80 : vector<1x16xf32> to vector<8x16xf32>
    %82 = arith.addf %78, %81 : vector<8x16xf32>
    %c3 = arith.constant 3 : index
    %c0_48 = arith.constant 0 : index
    %c0_49 = arith.constant 0 : index
    %83 = vector.load %arg4[%c3, %c0_48, %c0_49] : memref<12x32x16xbf16, #tpu.memory_space<vmem>>, vector<1x32x16xbf16>
    %84 = vector.shape_cast %83 : vector<1x32x16xbf16> to vector<32x16xbf16>
    %85 = arith.truncf %27 : vector<8x32xf32> to vector<8x32xbf16>
    %cst_50 = arith.constant dense<0.000000e+00> : vector<8x16xf32>
    %86 = tpu.matmul %85, %84, %cst_50 {dimension_numbers = #tpu.dot_dimension_numbers<[1], [0], [0], [1], [0, 0, 1, 1], [], []>} : vector<8x32xbf16>, vector<32x16xbf16>, vector<8x16xf32> -> vector<8x16xf32>
    %c3_51 = arith.constant 3 : index
    %c0_52 = arith.constant 0 : index
    %c0_53 = arith.constant 0 : index
    %87 = vector.load %arg5[%c3_51, %c0_52, %c0_53] : memref<12x1x16xf32, #tpu.memory_space<vmem>>, vector<1x1x16xf32>
    %88 = vector.shape_cast %87 : vector<1x1x16xf32> to vector<1x16xf32>
    %89 = vector.broadcast %88 : vector<1x16xf32> to vector<8x16xf32>
    %90 = arith.addf %86, %89 : vector<8x16xf32>
    %c5 = arith.constant 5 : index
    %c0_54 = arith.constant 0 : index
    %c0_55 = arith.constant 0 : index
    %91 = vector.load %arg4[%c5, %c0_54, %c0_55] : memref<12x32x16xbf16, #tpu.memory_space<vmem>>, vector<1x32x16xbf16>
    %92 = vector.shape_cast %91 : vector<1x32x16xbf16> to vector<32x16xbf16>
    %93 = arith.truncf %27 : vector<8x32xf32> to vector<8x32xbf16>
    %cst_56 = arith.constant dense<0.000000e+00> : vector<8x16xf32>
    %94 = tpu.matmul %93, %92, %cst_56 {dimension_numbers = #tpu.dot_dimension_numbers<[1], [0], [0], [1], [0, 0, 1, 1], [], []>} : vector<8x32xbf16>, vector<32x16xbf16>, vector<8x16xf32> -> vector<8x16xf32>
    %c5_57 = arith.constant 5 : index
    %c0_58 = arith.constant 0 : index
    %c0_59 = arith.constant 0 : index
    %95 = vector.load %arg5[%c5_57, %c0_58, %c0_59] : memref<12x1x16xf32, #tpu.memory_space<vmem>>, vector<1x1x16xf32>
    %96 = vector.shape_cast %95 : vector<1x1x16xf32> to vector<1x16xf32>
    %97 = vector.broadcast %96 : vector<1x16xf32> to vector<8x16xf32>
    %98 = arith.addf %94, %97 : vector<8x16xf32>
    %99 = arith.truncf %82 : vector<8x16xf32> to vector<8x16xbf16>
    %100 = arith.truncf %90 : vector<8x16xf32> to vector<8x16xbf16>
    %cst_60 = arith.constant dense<0.000000e+00> : vector<8x8xf32>
    %101 = tpu.matmul %99, %100, %cst_60 {dimension_numbers = #tpu.dot_dimension_numbers<[1], [1], [0], [0], [0, 0, 1, 0], [], []>} : vector<8x16xbf16>, vector<8x16xbf16>, vector<8x8xf32> -> vector<8x8xf32>
    %102 = arith.addf %101, %29 : vector<8x8xf32>
    %cst_61 = arith.constant dense<0xFF800000> : vector<8xf32>
    %103 = vector.multi_reduction <maximumf>, %102, %cst_61 [1] : vector<8x8xf32> to vector<8xf32>
    %104 = vector.shape_cast %103 : vector<8xf32> to vector<8x1xf32>
    %105 = vector.broadcast %104 : vector<8x1xf32> to vector<8x8xf32>
    %106 = arith.subf %102, %105 : vector<8x8xf32>
    %107 = math.exp %106 : vector<8x8xf32>
    %cst_62 = arith.constant dense<0.000000e+00> : vector<8xf32>
    %108 = vector.multi_reduction <add>, %107, %cst_62 [1] : vector<8x8xf32> to vector<8xf32>
    %109 = vector.shape_cast %108 : vector<8xf32> to vector<8x1xf32>
    %110 = tpu.reciprocal %109 {approx = true} : vector<8x1xf32> -> vector<8x1xf32>
    %111 = vector.broadcast %110 : vector<8x1xf32> to vector<8x8xf32>
    %112 = arith.mulf %107, %111 : vector<8x8xf32>
    %113 = arith.truncf %98 : vector<8x16xf32> to vector<8x16xbf16>
    %114 = arith.truncf %112 : vector<8x8xf32> to vector<8x8xbf16>
    %cst_63 = arith.constant dense<0.000000e+00> : vector<8x16xf32>
    %115 = tpu.matmul %114, %113, %cst_63 {dimension_numbers = #tpu.dot_dimension_numbers<[1], [0], [0], [1], [0, 0, 1, 1], [], []>} : vector<8x8xbf16>, vector<8x16xbf16>, vector<8x16xf32> -> vector<8x16xf32>
    %c1_64 = arith.constant 1 : index
    %c0_65 = arith.constant 0 : index
    %c0_66 = arith.constant 0 : index
    %116 = vector.load %arg6[%c1_64, %c0_65, %c0_66] : memref<4x16x32xbf16, #tpu.memory_space<vmem>>, vector<1x16x32xbf16>
    %117 = vector.shape_cast %116 : vector<1x16x32xbf16> to vector<16x32xbf16>
    %118 = arith.truncf %115 : vector<8x16xf32> to vector<8x16xbf16>
    %cst_67 = arith.constant dense<0.000000e+00> : vector<8x32xf32>
    %119 = tpu.matmul %118, %117, %cst_67 {dimension_numbers = #tpu.dot_dimension_numbers<[1], [0], [0], [1], [0, 0, 1, 1], [], []>} : vector<8x16xbf16>, vector<16x32xbf16>, vector<8x32xf32> -> vector<8x32xf32>
    %120 = arith.addf %74, %119 : vector<8x32xf32>
    %c0_68 = arith.constant 0 : index
    %c0_69 = arith.constant 0 : index
    %c0_70 = arith.constant 0 : index
    %121 = vector.load %arg10[%c0_68, %c0_69, %c0_70] : memref<12x1x32xf32, #tpu.memory_space<vmem>>, vector<1x1x32xf32>
    %122 = vector.shape_cast %121 : vector<1x1x32xf32> to vector<1x32xf32>
    %123 = vector.broadcast %122 : vector<1x32xf32> to vector<8x32xf32>
    %124 = arith.addf %120, %123 : vector<8x32xf32>
    %125 = arith.addf %124, %27 : vector<8x32xf32>
    %c1_71 = arith.constant 1 : index
    %c0_72 = arith.constant 0 : index
    %c0_73 = arith.constant 0 : index
    %126 = vector.load %arg10[%c1_71, %c0_72, %c0_73] : memref<12x1x32xf32, #tpu.memory_space<vmem>>, vector<1x1x32xf32>
    %127 = vector.shape_cast %126 : vector<1x1x32xf32> to vector<1x32xf32>
    %c2_74 = arith.constant 2 : index
    %c0_75 = arith.constant 0 : index
    %c0_76 = arith.constant 0 : index
    %128 = vector.load %arg10[%c2_74, %c0_75, %c0_76] : memref<12x1x32xf32, #tpu.memory_space<vmem>>, vector<1x1x32xf32>
    %129 = vector.shape_cast %128 : vector<1x1x32xf32> to vector<1x32xf32>
    %cst_77 = arith.constant dense<0.000000e+00> : vector<8xf32>
    %130 = vector.multi_reduction <add>, %125, %cst_77 [1] : vector<8x32xf32> to vector<8xf32>
    %131 = vector.shape_cast %130 : vector<8xf32> to vector<8x1xf32>
    %cst_78 = arith.constant 3.200000e+01 : f32
    %132 = vector.broadcast %cst_78 : f32 to vector<8x1xf32>
    %133 = arith.divf %131, %132 : vector<8x1xf32>
    %134 = vector.broadcast %133 : vector<8x1xf32> to vector<8x32xf32>
    %135 = arith.subf %125, %134 : vector<8x32xf32>
    %136 = arith.mulf %135, %135 : vector<8x32xf32>
    %cst_79 = arith.constant dense<0.000000e+00> : vector<8xf32>
    %137 = vector.multi_reduction <add>, %136, %cst_79 [1] : vector<8x32xf32> to vector<8xf32>
    %138 = vector.shape_cast %137 : vector<8xf32> to vector<8x1xf32>
    %cst_80 = arith.constant 3.200000e+01 : f32
    %139 = vector.broadcast %cst_80 : f32 to vector<8x1xf32>
    %140 = arith.divf %138, %139 : vector<8x1xf32>
    %141 = vector.broadcast %133 : vector<8x1xf32> to vector<8x32xf32>
    %142 = arith.subf %125, %141 : vector<8x32xf32>
    %cst_81 = arith.constant 9.99999996E-13 : f32
    %143 = vector.broadcast %cst_81 : f32 to vector<8x1xf32>
    %144 = arith.addf %140, %143 : vector<8x1xf32>
    %145 = math.rsqrt %144 : vector<8x1xf32>
    %146 = vector.broadcast %145 : vector<8x1xf32> to vector<8x32xf32>
    %147 = arith.mulf %142, %146 : vector<8x32xf32>
    %148 = vector.broadcast %127 : vector<1x32xf32> to vector<8x32xf32>
    %149 = arith.mulf %147, %148 : vector<8x32xf32>
    %150 = vector.broadcast %129 : vector<1x32xf32> to vector<8x32xf32>
    %151 = arith.addf %149, %150 : vector<8x32xf32>
    %c0_82 = arith.constant 0 : index
    %c0_83 = arith.constant 0 : index
    %c0_84 = arith.constant 0 : index
    %152 = vector.load %arg7[%c0_82, %c0_83, %c0_84] : memref<2x32x64xbf16, #tpu.memory_space<vmem>>, vector<1x32x64xbf16>
    %153 = vector.shape_cast %152 : vector<1x32x64xbf16> to vector<32x64xbf16>
    %154 = arith.truncf %151 : vector<8x32xf32> to vector<8x32xbf16>
    %cst_85 = arith.constant dense<0.000000e+00> : vector<8x64xf32>
    %155 = tpu.matmul %154, %153, %cst_85 {dimension_numbers = #tpu.dot_dimension_numbers<[1], [0], [0], [1], [0, 0, 1, 1], [], []>} : vector<8x32xbf16>, vector<32x64xbf16>, vector<8x64xf32> -> vector<8x64xf32>
    %c0_86 = arith.constant 0 : index
    %c0_87 = arith.constant 0 : index
    %c0_88 = arith.constant 0 : index
    %156 = vector.load %arg9[%c0_86, %c0_87, %c0_88] : memref<2x1x64xf32, #tpu.memory_space<vmem>>, vector<1x1x64xf32>
    %157 = vector.shape_cast %156 : vector<1x1x64xf32> to vector<1x64xf32>
    %158 = vector.broadcast %157 : vector<1x64xf32> to vector<8x64xf32>
    %159 = arith.addf %155, %158 : vector<8x64xf32>
    %cst_89 = arith.constant 5.000000e-01 : f32
    %160 = vector.broadcast %cst_89 : f32 to vector<8x64xf32>
    %161 = arith.mulf %160, %159 : vector<8x64xf32>
    %cst_90 = arith.constant 4.471500e-02 : f32
    %162 = vector.broadcast %cst_90 : f32 to vector<8x64xf32>
    %163 = arith.mulf %162, %159 : vector<8x64xf32>
    %164 = arith.mulf %163, %159 : vector<8x64xf32>
    %165 = arith.mulf %164, %159 : vector<8x64xf32>
    %166 = arith.addf %159, %165 : vector<8x64xf32>
    %cst_91 = arith.constant 0.797884583 : f32
    %167 = vector.broadcast %cst_91 : f32 to vector<8x64xf32>
    %168 = arith.mulf %167, %166 : vector<8x64xf32>
    %169 = math.tanh %168 : vector<8x64xf32>
    %cst_92 = arith.constant 1.000000e+00 : f32
    %170 = vector.broadcast %cst_92 : f32 to vector<8x64xf32>
    %171 = arith.addf %170, %169 : vector<8x64xf32>
    %172 = arith.mulf %161, %171 : vector<8x64xf32>
    %c0_93 = arith.constant 0 : index
    %c0_94 = arith.constant 0 : index
    %c0_95 = arith.constant 0 : index
    %173 = vector.load %arg8[%c0_93, %c0_94, %c0_95] : memref<2x64x32xbf16, #tpu.memory_space<vmem>>, vector<1x64x32xbf16>
    %174 = vector.shape_cast %173 : vector<1x64x32xbf16> to vector<64x32xbf16>
    %175 = arith.truncf %172 : vector<8x64xf32> to vector<8x64xbf16>
    %cst_96 = arith.constant dense<0.000000e+00> : vector<8x32xf32>
    %176 = tpu.matmul %175, %174, %cst_96 {dimension_numbers = #tpu.dot_dimension_numbers<[1], [0], [0], [1], [0, 0, 1, 1], [], []>} : vector<8x64xbf16>, vector<64x32xbf16>, vector<8x32xf32> -> vector<8x32xf32>
    %c3_97 = arith.constant 3 : index
    %c0_98 = arith.constant 0 : index
    %c0_99 = arith.constant 0 : index
    %177 = vector.load %arg10[%c3_97, %c0_98, %c0_99] : memref<12x1x32xf32, #tpu.memory_space<vmem>>, vector<1x1x32xf32>
    %178 = vector.shape_cast %177 : vector<1x1x32xf32> to vector<1x32xf32>
    %179 = vector.broadcast %178 : vector<1x32xf32> to vector<8x32xf32>
    %180 = arith.addf %176, %179 : vector<8x32xf32>
    %181 = arith.addf %180, %151 : vector<8x32xf32>
    %c4_100 = arith.constant 4 : index
    %c0_101 = arith.constant 0 : index
    %c0_102 = arith.constant 0 : index
    %182 = vector.load %arg10[%c4_100, %c0_101, %c0_102] : memref<12x1x32xf32, #tpu.memory_space<vmem>>, vector<1x1x32xf32>
    %183 = vector.shape_cast %182 : vector<1x1x32xf32> to vector<1x32xf32>
    %c5_103 = arith.constant 5 : index
    %c0_104 = arith.constant 0 : index
    %c0_105 = arith.constant 0 : index
    %184 = vector.load %arg10[%c5_103, %c0_104, %c0_105] : memref<12x1x32xf32, #tpu.memory_space<vmem>>, vector<1x1x32xf32>
    %185 = vector.shape_cast %184 : vector<1x1x32xf32> to vector<1x32xf32>
    %cst_106 = arith.constant dense<0.000000e+00> : vector<8xf32>
    %186 = vector.multi_reduction <add>, %181, %cst_106 [1] : vector<8x32xf32> to vector<8xf32>
    %187 = vector.shape_cast %186 : vector<8xf32> to vector<8x1xf32>
    %cst_107 = arith.constant 3.200000e+01 : f32
    %188 = vector.broadcast %cst_107 : f32 to vector<8x1xf32>
    %189 = arith.divf %187, %188 : vector<8x1xf32>
    %190 = vector.broadcast %189 : vector<8x1xf32> to vector<8x32xf32>
    %191 = arith.subf %181, %190 : vector<8x32xf32>
    %192 = arith.mulf %191, %191 : vector<8x32xf32>
    %cst_108 = arith.constant dense<0.000000e+00> : vector<8xf32>
    %193 = vector.multi_reduction <add>, %192, %cst_108 [1] : vector<8x32xf32> to vector<8xf32>
    %194 = vector.shape_cast %193 : vector<8xf32> to vector<8x1xf32>
    %cst_109 = arith.constant 3.200000e+01 : f32
    %195 = vector.broadcast %cst_109 : f32 to vector<8x1xf32>
    %196 = arith.divf %194, %195 : vector<8x1xf32>
    %197 = vector.broadcast %189 : vector<8x1xf32> to vector<8x32xf32>
    %198 = arith.subf %181, %197 : vector<8x32xf32>
    %cst_110 = arith.constant 9.99999996E-13 : f32
    %199 = vector.broadcast %cst_110 : f32 to vector<8x1xf32>
    %200 = arith.addf %196, %199 : vector<8x1xf32>
    %201 = math.rsqrt %200 : vector<8x1xf32>
    %202 = vector.broadcast %201 : vector<8x1xf32> to vector<8x32xf32>
    %203 = arith.mulf %198, %202 : vector<8x32xf32>
    %204 = vector.broadcast %183 : vector<1x32xf32> to vector<8x32xf32>
    %205 = arith.mulf %203, %204 : vector<8x32xf32>
    %206 = vector.broadcast %185 : vector<1x32xf32> to vector<8x32xf32>
    %207 = arith.addf %205, %206 : vector<8x32xf32>
    %c6 = arith.constant 6 : index
    %c0_111 = arith.constant 0 : index
    %c0_112 = arith.constant 0 : index
    %208 = vector.load %arg4[%c6, %c0_111, %c0_112] : memref<12x32x16xbf16, #tpu.memory_space<vmem>>, vector<1x32x16xbf16>
    %209 = vector.shape_cast %208 : vector<1x32x16xbf16> to vector<32x16xbf16>
    %210 = arith.truncf %207 : vector<8x32xf32> to vector<8x32xbf16>
    %cst_113 = arith.constant dense<0.000000e+00> : vector<8x16xf32>
    %211 = tpu.matmul %210, %209, %cst_113 {dimension_numbers = #tpu.dot_dimension_numbers<[1], [0], [0], [1], [0, 0, 1, 1], [], []>} : vector<8x32xbf16>, vector<32x16xbf16>, vector<8x16xf32> -> vector<8x16xf32>
    %c6_114 = arith.constant 6 : index
    %c0_115 = arith.constant 0 : index
    %c0_116 = arith.constant 0 : index
    %212 = vector.load %arg5[%c6_114, %c0_115, %c0_116] : memref<12x1x16xf32, #tpu.memory_space<vmem>>, vector<1x1x16xf32>
    %213 = vector.shape_cast %212 : vector<1x1x16xf32> to vector<1x16xf32>
    %214 = vector.broadcast %213 : vector<1x16xf32> to vector<8x16xf32>
    %215 = arith.addf %211, %214 : vector<8x16xf32>
    %c8 = arith.constant 8 : index
    %c0_117 = arith.constant 0 : index
    %c0_118 = arith.constant 0 : index
    %216 = vector.load %arg4[%c8, %c0_117, %c0_118] : memref<12x32x16xbf16, #tpu.memory_space<vmem>>, vector<1x32x16xbf16>
    %217 = vector.shape_cast %216 : vector<1x32x16xbf16> to vector<32x16xbf16>
    %218 = arith.truncf %207 : vector<8x32xf32> to vector<8x32xbf16>
    %cst_119 = arith.constant dense<0.000000e+00> : vector<8x16xf32>
    %219 = tpu.matmul %218, %217, %cst_119 {dimension_numbers = #tpu.dot_dimension_numbers<[1], [0], [0], [1], [0, 0, 1, 1], [], []>} : vector<8x32xbf16>, vector<32x16xbf16>, vector<8x16xf32> -> vector<8x16xf32>
    %c8_120 = arith.constant 8 : index
    %c0_121 = arith.constant 0 : index
    %c0_122 = arith.constant 0 : index
    %220 = vector.load %arg5[%c8_120, %c0_121, %c0_122] : memref<12x1x16xf32, #tpu.memory_space<vmem>>, vector<1x1x16xf32>
    %221 = vector.shape_cast %220 : vector<1x1x16xf32> to vector<1x16xf32>
    %222 = vector.broadcast %221 : vector<1x16xf32> to vector<8x16xf32>
    %223 = arith.addf %219, %222 : vector<8x16xf32>
    %c10 = arith.constant 10 : index
    %c0_123 = arith.constant 0 : index
    %c0_124 = arith.constant 0 : index
    %224 = vector.load %arg4[%c10, %c0_123, %c0_124] : memref<12x32x16xbf16, #tpu.memory_space<vmem>>, vector<1x32x16xbf16>
    %225 = vector.shape_cast %224 : vector<1x32x16xbf16> to vector<32x16xbf16>
    %226 = arith.truncf %207 : vector<8x32xf32> to vector<8x32xbf16>
    %cst_125 = arith.constant dense<0.000000e+00> : vector<8x16xf32>
    %227 = tpu.matmul %226, %225, %cst_125 {dimension_numbers = #tpu.dot_dimension_numbers<[1], [0], [0], [1], [0, 0, 1, 1], [], []>} : vector<8x32xbf16>, vector<32x16xbf16>, vector<8x16xf32> -> vector<8x16xf32>
    %c10_126 = arith.constant 10 : index
    %c0_127 = arith.constant 0 : index
    %c0_128 = arith.constant 0 : index
    %228 = vector.load %arg5[%c10_126, %c0_127, %c0_128] : memref<12x1x16xf32, #tpu.memory_space<vmem>>, vector<1x1x16xf32>
    %229 = vector.shape_cast %228 : vector<1x1x16xf32> to vector<1x16xf32>
    %230 = vector.broadcast %229 : vector<1x16xf32> to vector<8x16xf32>
    %231 = arith.addf %227, %230 : vector<8x16xf32>
    %232 = arith.truncf %215 : vector<8x16xf32> to vector<8x16xbf16>
    %233 = arith.truncf %223 : vector<8x16xf32> to vector<8x16xbf16>
    %cst_129 = arith.constant dense<0.000000e+00> : vector<8x8xf32>
    %234 = tpu.matmul %232, %233, %cst_129 {dimension_numbers = #tpu.dot_dimension_numbers<[1], [1], [0], [0], [0, 0, 1, 0], [], []>} : vector<8x16xbf16>, vector<8x16xbf16>, vector<8x8xf32> -> vector<8x8xf32>
    %235 = arith.addf %234, %29 : vector<8x8xf32>
    %cst_130 = arith.constant dense<0xFF800000> : vector<8xf32>
    %236 = vector.multi_reduction <maximumf>, %235, %cst_130 [1] : vector<8x8xf32> to vector<8xf32>
    %237 = vector.shape_cast %236 : vector<8xf32> to vector<8x1xf32>
    %238 = vector.broadcast %237 : vector<8x1xf32> to vector<8x8xf32>
    %239 = arith.subf %235, %238 : vector<8x8xf32>
    %240 = math.exp %239 : vector<8x8xf32>
    %cst_131 = arith.constant dense<0.000000e+00> : vector<8xf32>
    %241 = vector.multi_reduction <add>, %240, %cst_131 [1] : vector<8x8xf32> to vector<8xf32>
    %242 = vector.shape_cast %241 : vector<8xf32> to vector<8x1xf32>
    %243 = tpu.reciprocal %242 {approx = true} : vector<8x1xf32> -> vector<8x1xf32>
    %244 = vector.broadcast %243 : vector<8x1xf32> to vector<8x8xf32>
    %245 = arith.mulf %240, %244 : vector<8x8xf32>
    %246 = arith.truncf %231 : vector<8x16xf32> to vector<8x16xbf16>
    %247 = arith.truncf %245 : vector<8x8xf32> to vector<8x8xbf16>
    %cst_132 = arith.constant dense<0.000000e+00> : vector<8x16xf32>
    %248 = tpu.matmul %247, %246, %cst_132 {dimension_numbers = #tpu.dot_dimension_numbers<[1], [0], [0], [1], [0, 0, 1, 1], [], []>} : vector<8x8xbf16>, vector<8x16xbf16>, vector<8x16xf32> -> vector<8x16xf32>
    %c2_133 = arith.constant 2 : index
    %c0_134 = arith.constant 0 : index
    %c0_135 = arith.constant 0 : index
    %249 = vector.load %arg6[%c2_133, %c0_134, %c0_135] : memref<4x16x32xbf16, #tpu.memory_space<vmem>>, vector<1x16x32xbf16>
    %250 = vector.shape_cast %249 : vector<1x16x32xbf16> to vector<16x32xbf16>
    %251 = arith.truncf %248 : vector<8x16xf32> to vector<8x16xbf16>
    %cst_136 = arith.constant dense<0.000000e+00> : vector<8x32xf32>
    %252 = tpu.matmul %251, %250, %cst_136 {dimension_numbers = #tpu.dot_dimension_numbers<[1], [0], [0], [1], [0, 0, 1, 1], [], []>} : vector<8x16xbf16>, vector<16x32xbf16>, vector<8x32xf32> -> vector<8x32xf32>
    %c7 = arith.constant 7 : index
    %c0_137 = arith.constant 0 : index
    %c0_138 = arith.constant 0 : index
    %253 = vector.load %arg4[%c7, %c0_137, %c0_138] : memref<12x32x16xbf16, #tpu.memory_space<vmem>>, vector<1x32x16xbf16>
    %254 = vector.shape_cast %253 : vector<1x32x16xbf16> to vector<32x16xbf16>
    %255 = arith.truncf %207 : vector<8x32xf32> to vector<8x32xbf16>
    %cst_139 = arith.constant dense<0.000000e+00> : vector<8x16xf32>
    %256 = tpu.matmul %255, %254, %cst_139 {dimension_numbers = #tpu.dot_dimension_numbers<[1], [0], [0], [1], [0, 0, 1, 1], [], []>} : vector<8x32xbf16>, vector<32x16xbf16>, vector<8x16xf32> -> vector<8x16xf32>
    %c7_140 = arith.constant 7 : index
    %c0_141 = arith.constant 0 : index
    %c0_142 = arith.constant 0 : index
    %257 = vector.load %arg5[%c7_140, %c0_141, %c0_142] : memref<12x1x16xf32, #tpu.memory_space<vmem>>, vector<1x1x16xf32>
    %258 = vector.shape_cast %257 : vector<1x1x16xf32> to vector<1x16xf32>
    %259 = vector.broadcast %258 : vector<1x16xf32> to vector<8x16xf32>
    %260 = arith.addf %256, %259 : vector<8x16xf32>
    %c9 = arith.constant 9 : index
    %c0_143 = arith.constant 0 : index
    %c0_144 = arith.constant 0 : index
    %261 = vector.load %arg4[%c9, %c0_143, %c0_144] : memref<12x32x16xbf16, #tpu.memory_space<vmem>>, vector<1x32x16xbf16>
    %262 = vector.shape_cast %261 : vector<1x32x16xbf16> to vector<32x16xbf16>
    %263 = arith.truncf %207 : vector<8x32xf32> to vector<8x32xbf16>
    %cst_145 = arith.constant dense<0.000000e+00> : vector<8x16xf32>
    %264 = tpu.matmul %263, %262, %cst_145 {dimension_numbers = #tpu.dot_dimension_numbers<[1], [0], [0], [1], [0, 0, 1, 1], [], []>} : vector<8x32xbf16>, vector<32x16xbf16>, vector<8x16xf32> -> vector<8x16xf32>
    %c9_146 = arith.constant 9 : index
    %c0_147 = arith.constant 0 : index
    %c0_148 = arith.constant 0 : index
    %265 = vector.load %arg5[%c9_146, %c0_147, %c0_148] : memref<12x1x16xf32, #tpu.memory_space<vmem>>, vector<1x1x16xf32>
    %266 = vector.shape_cast %265 : vector<1x1x16xf32> to vector<1x16xf32>
    %267 = vector.broadcast %266 : vector<1x16xf32> to vector<8x16xf32>
    %268 = arith.addf %264, %267 : vector<8x16xf32>
    %c11 = arith.constant 11 : index
    %c0_149 = arith.constant 0 : index
    %c0_150 = arith.constant 0 : index
    %269 = vector.load %arg4[%c11, %c0_149, %c0_150] : memref<12x32x16xbf16, #tpu.memory_space<vmem>>, vector<1x32x16xbf16>
    %270 = vector.shape_cast %269 : vector<1x32x16xbf16> to vector<32x16xbf16>
    %271 = arith.truncf %207 : vector<8x32xf32> to vector<8x32xbf16>
    %cst_151 = arith.constant dense<0.000000e+00> : vector<8x16xf32>
    %272 = tpu.matmul %271, %270, %cst_151 {dimension_numbers = #tpu.dot_dimension_numbers<[1], [0], [0], [1], [0, 0, 1, 1], [], []>} : vector<8x32xbf16>, vector<32x16xbf16>, vector<8x16xf32> -> vector<8x16xf32>
    %c11_152 = arith.constant 11 : index
    %c0_153 = arith.constant 0 : index
    %c0_154 = arith.constant 0 : index
    %273 = vector.load %arg5[%c11_152, %c0_153, %c0_154] : memref<12x1x16xf32, #tpu.memory_space<vmem>>, vector<1x1x16xf32>
    %274 = vector.shape_cast %273 : vector<1x1x16xf32> to vector<1x16xf32>
    %275 = vector.broadcast %274 : vector<1x16xf32> to vector<8x16xf32>
    %276 = arith.addf %272, %275 : vector<8x16xf32>
    %277 = arith.truncf %260 : vector<8x16xf32> to vector<8x16xbf16>
    %278 = arith.truncf %268 : vector<8x16xf32> to vector<8x16xbf16>
    %cst_155 = arith.constant dense<0.000000e+00> : vector<8x8xf32>
    %279 = tpu.matmul %277, %278, %cst_155 {dimension_numbers = #tpu.dot_dimension_numbers<[1], [1], [0], [0], [0, 0, 1, 0], [], []>} : vector<8x16xbf16>, vector<8x16xbf16>, vector<8x8xf32> -> vector<8x8xf32>
    %280 = arith.addf %279, %29 : vector<8x8xf32>
    %cst_156 = arith.constant dense<0xFF800000> : vector<8xf32>
    %281 = vector.multi_reduction <maximumf>, %280, %cst_156 [1] : vector<8x8xf32> to vector<8xf32>
    %282 = vector.shape_cast %281 : vector<8xf32> to vector<8x1xf32>
    %283 = vector.broadcast %282 : vector<8x1xf32> to vector<8x8xf32>
    %284 = arith.subf %280, %283 : vector<8x8xf32>
    %285 = math.exp %284 : vector<8x8xf32>
    %cst_157 = arith.constant dense<0.000000e+00> : vector<8xf32>
    %286 = vector.multi_reduction <add>, %285, %cst_157 [1] : vector<8x8xf32> to vector<8xf32>
    %287 = vector.shape_cast %286 : vector<8xf32> to vector<8x1xf32>
    %288 = tpu.reciprocal %287 {approx = true} : vector<8x1xf32> -> vector<8x1xf32>
    %289 = vector.broadcast %288 : vector<8x1xf32> to vector<8x8xf32>
    %290 = arith.mulf %285, %289 : vector<8x8xf32>
    %291 = arith.truncf %276 : vector<8x16xf32> to vector<8x16xbf16>
    %292 = arith.truncf %290 : vector<8x8xf32> to vector<8x8xbf16>
    %cst_158 = arith.constant dense<0.000000e+00> : vector<8x16xf32>
    %293 = tpu.matmul %292, %291, %cst_158 {dimension_numbers = #tpu.dot_dimension_numbers<[1], [0], [0], [1], [0, 0, 1, 1], [], []>} : vector<8x8xbf16>, vector<8x16xbf16>, vector<8x16xf32> -> vector<8x16xf32>
    %c3_159 = arith.constant 3 : index
    %c0_160 = arith.constant 0 : index
    %c0_161 = arith.constant 0 : index
    %294 = vector.load %arg6[%c3_159, %c0_160, %c0_161] : memref<4x16x32xbf16, #tpu.memory_space<vmem>>, vector<1x16x32xbf16>
    %295 = vector.shape_cast %294 : vector<1x16x32xbf16> to vector<16x32xbf16>
    %296 = arith.truncf %293 : vector<8x16xf32> to vector<8x16xbf16>
    %cst_162 = arith.constant dense<0.000000e+00> : vector<8x32xf32>
    %297 = tpu.matmul %296, %295, %cst_162 {dimension_numbers = #tpu.dot_dimension_numbers<[1], [0], [0], [1], [0, 0, 1, 1], [], []>} : vector<8x16xbf16>, vector<16x32xbf16>, vector<8x32xf32> -> vector<8x32xf32>
    %298 = arith.addf %252, %297 : vector<8x32xf32>
    %c6_163 = arith.constant 6 : index
    %c0_164 = arith.constant 0 : index
    %c0_165 = arith.constant 0 : index
    %299 = vector.load %arg10[%c6_163, %c0_164, %c0_165] : memref<12x1x32xf32, #tpu.memory_space<vmem>>, vector<1x1x32xf32>
    %300 = vector.shape_cast %299 : vector<1x1x32xf32> to vector<1x32xf32>
    %301 = vector.broadcast %300 : vector<1x32xf32> to vector<8x32xf32>
    %302 = arith.addf %298, %301 : vector<8x32xf32>
    %303 = arith.addf %302, %207 : vector<8x32xf32>
    %c7_166 = arith.constant 7 : index
    %c0_167 = arith.constant 0 : index
    %c0_168 = arith.constant 0 : index
    %304 = vector.load %arg10[%c7_166, %c0_167, %c0_168] : memref<12x1x32xf32, #tpu.memory_space<vmem>>, vector<1x1x32xf32>
    %305 = vector.shape_cast %304 : vector<1x1x32xf32> to vector<1x32xf32>
    %c8_169 = arith.constant 8 : index
    %c0_170 = arith.constant 0 : index
    %c0_171 = arith.constant 0 : index
    %306 = vector.load %arg10[%c8_169, %c0_170, %c0_171] : memref<12x1x32xf32, #tpu.memory_space<vmem>>, vector<1x1x32xf32>
    %307 = vector.shape_cast %306 : vector<1x1x32xf32> to vector<1x32xf32>
    %cst_172 = arith.constant dense<0.000000e+00> : vector<8xf32>
    %308 = vector.multi_reduction <add>, %303, %cst_172 [1] : vector<8x32xf32> to vector<8xf32>
    %309 = vector.shape_cast %308 : vector<8xf32> to vector<8x1xf32>
    %cst_173 = arith.constant 3.200000e+01 : f32
    %310 = vector.broadcast %cst_173 : f32 to vector<8x1xf32>
    %311 = arith.divf %309, %310 : vector<8x1xf32>
    %312 = vector.broadcast %311 : vector<8x1xf32> to vector<8x32xf32>
    %313 = arith.subf %303, %312 : vector<8x32xf32>
    %314 = arith.mulf %313, %313 : vector<8x32xf32>
    %cst_174 = arith.constant dense<0.000000e+00> : vector<8xf32>
    %315 = vector.multi_reduction <add>, %314, %cst_174 [1] : vector<8x32xf32> to vector<8xf32>
    %316 = vector.shape_cast %315 : vector<8xf32> to vector<8x1xf32>
    %cst_175 = arith.constant 3.200000e+01 : f32
    %317 = vector.broadcast %cst_175 : f32 to vector<8x1xf32>
    %318 = arith.divf %316, %317 : vector<8x1xf32>
    %319 = vector.broadcast %311 : vector<8x1xf32> to vector<8x32xf32>
    %320 = arith.subf %303, %319 : vector<8x32xf32>
    %cst_176 = arith.constant 9.99999996E-13 : f32
    %321 = vector.broadcast %cst_176 : f32 to vector<8x1xf32>
    %322 = arith.addf %318, %321 : vector<8x1xf32>
    %323 = math.rsqrt %322 : vector<8x1xf32>
    %324 = vector.broadcast %323 : vector<8x1xf32> to vector<8x32xf32>
    %325 = arith.mulf %320, %324 : vector<8x32xf32>
    %326 = vector.broadcast %305 : vector<1x32xf32> to vector<8x32xf32>
    %327 = arith.mulf %325, %326 : vector<8x32xf32>
    %328 = vector.broadcast %307 : vector<1x32xf32> to vector<8x32xf32>
    %329 = arith.addf %327, %328 : vector<8x32xf32>
    %c1_177 = arith.constant 1 : index
    %c0_178 = arith.constant 0 : index
    %c0_179 = arith.constant 0 : index
    %330 = vector.load %arg7[%c1_177, %c0_178, %c0_179] : memref<2x32x64xbf16, #tpu.memory_space<vmem>>, vector<1x32x64xbf16>
    %331 = vector.shape_cast %330 : vector<1x32x64xbf16> to vector<32x64xbf16>
    %332 = arith.truncf %329 : vector<8x32xf32> to vector<8x32xbf16>
    %cst_180 = arith.constant dense<0.000000e+00> : vector<8x64xf32>
    %333 = tpu.matmul %332, %331, %cst_180 {dimension_numbers = #tpu.dot_dimension_numbers<[1], [0], [0], [1], [0, 0, 1, 1], [], []>} : vector<8x32xbf16>, vector<32x64xbf16>, vector<8x64xf32> -> vector<8x64xf32>
    %c1_181 = arith.constant 1 : index
    %c0_182 = arith.constant 0 : index
    %c0_183 = arith.constant 0 : index
    %334 = vector.load %arg9[%c1_181, %c0_182, %c0_183] : memref<2x1x64xf32, #tpu.memory_space<vmem>>, vector<1x1x64xf32>
    %335 = vector.shape_cast %334 : vector<1x1x64xf32> to vector<1x64xf32>
    %336 = vector.broadcast %335 : vector<1x64xf32> to vector<8x64xf32>
    %337 = arith.addf %333, %336 : vector<8x64xf32>
    %cst_184 = arith.constant 5.000000e-01 : f32
    %338 = vector.broadcast %cst_184 : f32 to vector<8x64xf32>
    %339 = arith.mulf %338, %337 : vector<8x64xf32>
    %cst_185 = arith.constant 4.471500e-02 : f32
    %340 = vector.broadcast %cst_185 : f32 to vector<8x64xf32>
    %341 = arith.mulf %340, %337 : vector<8x64xf32>
    %342 = arith.mulf %341, %337 : vector<8x64xf32>
    %343 = arith.mulf %342, %337 : vector<8x64xf32>
    %344 = arith.addf %337, %343 : vector<8x64xf32>
    %cst_186 = arith.constant 0.797884583 : f32
    %345 = vector.broadcast %cst_186 : f32 to vector<8x64xf32>
    %346 = arith.mulf %345, %344 : vector<8x64xf32>
    %347 = math.tanh %346 : vector<8x64xf32>
    %cst_187 = arith.constant 1.000000e+00 : f32
    %348 = vector.broadcast %cst_187 : f32 to vector<8x64xf32>
    %349 = arith.addf %348, %347 : vector<8x64xf32>
    %350 = arith.mulf %339, %349 : vector<8x64xf32>
    %c1_188 = arith.constant 1 : index
    %c0_189 = arith.constant 0 : index
    %c0_190 = arith.constant 0 : index
    %351 = vector.load %arg8[%c1_188, %c0_189, %c0_190] : memref<2x64x32xbf16, #tpu.memory_space<vmem>>, vector<1x64x32xbf16>
    %352 = vector.shape_cast %351 : vector<1x64x32xbf16> to vector<64x32xbf16>
    %353 = arith.truncf %350 : vector<8x64xf32> to vector<8x64xbf16>
    %cst_191 = arith.constant dense<0.000000e+00> : vector<8x32xf32>
    %354 = tpu.matmul %353, %352, %cst_191 {dimension_numbers = #tpu.dot_dimension_numbers<[1], [0], [0], [1], [0, 0, 1, 1], [], []>} : vector<8x64xbf16>, vector<64x32xbf16>, vector<8x32xf32> -> vector<8x32xf32>
    %c9_192 = arith.constant 9 : index
    %c0_193 = arith.constant 0 : index
    %c0_194 = arith.constant 0 : index
    %355 = vector.load %arg10[%c9_192, %c0_193, %c0_194] : memref<12x1x32xf32, #tpu.memory_space<vmem>>, vector<1x1x32xf32>
    %356 = vector.shape_cast %355 : vector<1x1x32xf32> to vector<1x32xf32>
    %357 = vector.broadcast %356 : vector<1x32xf32> to vector<8x32xf32>
    %358 = arith.addf %354, %357 : vector<8x32xf32>
    %359 = arith.addf %358, %329 : vector<8x32xf32>
    %c10_195 = arith.constant 10 : index
    %c0_196 = arith.constant 0 : index
    %c0_197 = arith.constant 0 : index
    %360 = vector.load %arg10[%c10_195, %c0_196, %c0_197] : memref<12x1x32xf32, #tpu.memory_space<vmem>>, vector<1x1x32xf32>
    %361 = vector.shape_cast %360 : vector<1x1x32xf32> to vector<1x32xf32>
    %c11_198 = arith.constant 11 : index
    %c0_199 = arith.constant 0 : index
    %c0_200 = arith.constant 0 : index
    %362 = vector.load %arg10[%c11_198, %c0_199, %c0_200] : memref<12x1x32xf32, #tpu.memory_space<vmem>>, vector<1x1x32xf32>
    %363 = vector.shape_cast %362 : vector<1x1x32xf32> to vector<1x32xf32>
    %cst_201 = arith.constant dense<0.000000e+00> : vector<8xf32>
    %364 = vector.multi_reduction <add>, %359, %cst_201 [1] : vector<8x32xf32> to vector<8xf32>
    %365 = vector.shape_cast %364 : vector<8xf32> to vector<8x1xf32>
    %cst_202 = arith.constant 3.200000e+01 : f32
    %366 = vector.broadcast %cst_202 : f32 to vector<8x1xf32>
    %367 = arith.divf %365, %366 : vector<8x1xf32>
    %368 = vector.broadcast %367 : vector<8x1xf32> to vector<8x32xf32>
    %369 = arith.subf %359, %368 : vector<8x32xf32>
    %370 = arith.mulf %369, %369 : vector<8x32xf32>
    %cst_203 = arith.constant dense<0.000000e+00> : vector<8xf32>
    %371 = vector.multi_reduction <add>, %370, %cst_203 [1] : vector<8x32xf32> to vector<8xf32>
    %372 = vector.shape_cast %371 : vector<8xf32> to vector<8x1xf32>
    %cst_204 = arith.constant 3.200000e+01 : f32
    %373 = vector.broadcast %cst_204 : f32 to vector<8x1xf32>
    %374 = arith.divf %372, %373 : vector<8x1xf32>
    %375 = vector.broadcast %367 : vector<8x1xf32> to vector<8x32xf32>
    %376 = arith.subf %359, %375 : vector<8x32xf32>
    %cst_205 = arith.constant 9.99999996E-13 : f32
    %377 = vector.broadcast %cst_205 : f32 to vector<8x1xf32>
    %378 = arith.addf %374, %377 : vector<8x1xf32>
    %379 = math.rsqrt %378 : vector<8x1xf32>
    %380 = vector.broadcast %379 : vector<8x1xf32> to vector<8x32xf32>
    %381 = arith.mulf %376, %380 : vector<8x32xf32>
    %382 = vector.broadcast %361 : vector<1x32xf32> to vector<8x32xf32>
    %383 = arith.mulf %381, %382 : vector<8x32xf32>
    %384 = vector.broadcast %363 : vector<1x32xf32> to vector<8x32xf32>
    %385 = arith.addf %383, %384 : vector<8x32xf32>
    %c0_206 = arith.constant 0 : index
    %c0_207 = arith.constant 0 : index
    %386 = vector.load %arg11[%c0_206, %c0_207] : memref<32x128xbf16, #tpu.memory_space<vmem>>, vector<32x128xbf16>
    %387 = arith.truncf %385 : vector<8x32xf32> to vector<8x32xbf16>
    %cst_208 = arith.constant dense<0.000000e+00> : vector<8x128xf32>
    %388 = tpu.matmul %387, %386, %cst_208 {dimension_numbers = #tpu.dot_dimension_numbers<[1], [0], [0], [1], [0, 0, 1, 1], [], []>} : vector<8x32xbf16>, vector<32x128xbf16>, vector<8x128xf32> -> vector<8x128xf32>
    %c0_209 = arith.constant 0 : index
    %c0_210 = arith.constant 0 : index
    %389 = vector.load %arg12[%c0_209, %c0_210] : memref<1x128xf32, #tpu.memory_space<vmem>>, vector<1x128xf32>
    %390 = vector.broadcast %389 : vector<1x128xf32> to vector<8x128xf32>
    %391 = arith.addf %388, %390 : vector<8x128xf32>
    %392 = vector.shape_cast %391 : vector<8x128xf32> to vector<1x8x128xf32>
    %c0_211 = arith.constant 0 : index
    %c0_212 = arith.constant 0 : index
    %c0_213 = arith.constant 0 : index
    %393 = vector.load %arg13[%c0_211, %c0_212, %c0_213] : memref<1x8x128xf32, #tpu.memory_space<vmem>>, vector<1x8x128xf32>
    tpu.vector_store %arg13[%c0_211, %c0_212, %c0_213], %392 {strides = array<i32>} : memref<1x8x128xf32, #tpu.memory_space<vmem>>, vector<1x8x128xf32>,
    return
  }
  func.func @transform_0(%arg0: i32) -> (i32, i32, i32) {
    %c0_i32 = arith.constant 0 : i32
    %c0_i32_0 = arith.constant 0 : i32
    %c0_i32_1 = arith.constant 0 : i32
    return %arg0, %c0_i32, %c0_i32_0 : i32, i32, i32
  }
  func.func @transform_1(%arg0: i32) -> (i32, i32, i32) {
    %c0_i32 = arith.constant 0 : i32
    %c0_i32_0 = arith.constant 0 : i32
    %c0_i32_1 = arith.constant 0 : i32
    return %arg0, %c0_i32, %c0_i32_0 : i32, i32, i32
  }
  func.func @transform_2(%arg0: i32) -> (i32, i32, i32) {
    %c0_i32 = arith.constant 0 : i32
    %c0_i32_0 = arith.constant 0 : i32
    %c0_i32_1 = arith.constant 0 : i32
    %c0_i32_2 = arith.constant 0 : i32
    return %c0_i32, %c0_i32_0, %c0_i32_1 : i32, i32, i32
  }
  func.func @transform_3(%arg0: i32) -> (i32, i32, i32) {
    %c0_i32 = arith.constant 0 : i32
    %c0_i32_0 = arith.constant 0 : i32
    %c0_i32_1 = arith.constant 0 : i32
    %c0_i32_2 = arith.constant 0 : i32
    return %c0_i32, %c0_i32_0, %c0_i32_1 : i32, i32, i32
  }
  func.func @transform_4(%arg0: i32) -> (i32, i32, i32) {
    %c0_i32 = arith.constant 0 : i32
    %c0_i32_0 = arith.constant 0 : i32
    %c0_i32_1 = arith.constant 0 : i32
    %c0_i32_2 = arith.constant 0 : i32
    return %c0_i32, %c0_i32_0, %c0_i32_1 : i32, i32, i32
  }
  func.func @transform_5(%arg0: i32) -> (i32, i32, i32) {
    %c0_i32 = arith.constant 0 : i32
    %c0_i32_0 = arith.constant 0 : i32
    %c0_i32_1 = arith.constant 0 : i32
    %c0_i32_2 = arith.constant 0 : i32
    return %c0_i32, %c0_i32_0, %c0_i32_1 : i32, i32, i32
  }
  func.func @transform_6(%arg0: i32) -> (i32, i32, i32) {
    %c0_i32 = arith.constant 0 : i32
    %c0_i32_0 = arith.constant 0 : i32
    %c0_i32_1 = arith.constant 0 : i32
    %c0_i32_2 = arith.constant 0 : i32
    return %c0_i32, %c0_i32_0, %c0_i32_1 : i32, i32, i32
  }
  func.func @transform_7(%arg0: i32) -> (i32, i32, i32) {
    %c0_i32 = arith.constant 0 : i32
    %c0_i32_0 = arith.constant 0 : i32
    %c0_i32_1 = arith.constant 0 : i32
    %c0_i32_2 = arith.constant 0 : i32
    return %c0_i32, %c0_i32_0, %c0_i32_1 : i32, i32, i32
  }
  func.func @transform_8(%arg0: i32) -> (i32, i32, i32) {
    %c0_i32 = arith.constant 0 : i32
    %c0_i32_0 = arith.constant 0 : i32
    %c0_i32_1 = arith.constant 0 : i32
    %c0_i32_2 = arith.constant 0 : i32
    return %c0_i32, %c0_i32_0, %c0_i32_1 : i32, i32, i32
  }
  func.func @transform_9(%arg0: i32) -> (i32, i32, i32) {
    %c0_i32 = arith.constant 0 : i32
    %c0_i32_0 = arith.constant 0 : i32
    %c0_i32_1 = arith.constant 0 : i32
    %c0_i32_2 = arith.constant 0 : i32
    return %c0_i32, %c0_i32_0, %c0_i32_1 : i32, i32, i32
  }
  func.func @transform_10(%arg0: i32) -> (i32, i32) {
    %c0_i32 = arith.constant 0 : i32
    %c0_i32_0 = arith.constant 0 : i32
    %c0_i32_1 = arith.constant 0 : i32
    return %c0_i32, %c0_i32_0 : i32, i32
  }
  func.func @transform_11(%arg0: i32) -> (i32, i32) {
    %c0_i32 = arith.constant 0 : i32
    %c0_i32_0 = arith.constant 0 : i32
    %c0_i32_1 = arith.constant 0 : i32
    return %c0_i32, %c0_i32_0 : i32, i32
  }
  func.func @transform_12(%arg0: i32) -> (i32, i32, i32) {
    %c0_i32 = arith.constant 0 : i32
    %c0_i32_0 = arith.constant 0 : i32
    %c0_i32_1 = arith.constant 0 : i32
    return %arg0, %c0_i32, %c0_i32_0 : i32, i32, i32
  }
}

</mosaic_0001>

<bundles_post_ra>
// kernel: bert_for_token_classification.1
= control target key start
LH: loop header
LB: loop body
LE: loop exit
PB: predicated region body
PF: predicated region fallthrough
CT: control target
= control target key end

     0   :  { %s2151_s21 = smov 0   ;;  %s2472_s0 = inlined_call_operand.vmem [shape: f32[2,8,32], index: 0, kind: input, shape index: {}]   ;;  %s2473_s1 = inlined_call_operand.vmem [shape: f32[2,8,8], index: 1, kind: input, shape index: {}]   ;;  %s2474_s2 = inlined_call_operand.vmem [shape: f32[2,1,32], index: 2, kind: input, shape index: {}]   ;;  %s2475_s3 = inlined_call_operand.vmem [shape: bf16[12,32,16], index: 3, kind: input, shape index: {}]   ;;  %s2476_s4 = inlined_call_operand.vmem [shape: f32[12,1,16], index: 4, kind: input, shape index: {}]   ;;  %s2477_s5 = inlined_call_operand.vmem [shape: bf16[4,16,32], index: 5, kind: input, shape index: {}]   ;;  %s2478_s6 = inlined_call_operand.vmem [shape: bf16[2,32,64], index: 6, kind: input, shape index: {}]   ;;  %s2479_s7 = inlined_call_operand.vmem [shape: bf16[2,64,32], index: 7, kind: input, shape index: {}]   ;;  %s2480_s8 = inlined_call_operand.vmem [shape: f32[2,1,64], index: 8, kind: input, shape index: {}]   ;;  %s2481_s9 = inlined_call_operand.vmem [shape: f32[12,1,32], index: 9, kind: input, shape index: {}]   ;;  %s2482_s10 = inlined_call_operand.vmem [shape: bf16[32,128], index: 10, kind: input, shape index: {}]   ;;  %s2483_s11 = inlined_call_operand.vmem [shape: f32[1,128], index: 11, kind: input, shape index: {}]   ;;  %s2484_s12 = inlined_call_operand.vmem [shape: f32[2,8,128], index: 12, kind: output, shape index: {}]  }
   0x1 LB: > { %s1672_s22 = sadd.s32 4294967295, %s2083_s21   ;;  %p1676_p0 = scmp.ge.s32.totalorder %s2083_s21, 1  ;;  %s2083_s21 = sphi %s2151_s21, %s22_s21  }
   0x2   : > { %p370_p1 = scmp.lt.s32.totalorder %s2083_s21, 3 }
   0x4   : > { %p371_p2 = pnand %p1676_p0, %p370_p1 }
   0x5   : > { %p414_p3 = scmp.lt.s32.totalorder (!%p371_p2), %s1672_s22, 1 }
   0x6   : > { %374 = sbr.rel (%p371_p2) target bundleno = 4467 (0x1173), region = 68 }
   0xb   : > { %s2486_s22 = smov (!%p414_p3, %s1672_s22), 1  ;;  %vm431_vm0 = vcmask 261120   ;;  %v2085_v2 = vmov 32.0   ;;  %v1966_v14 = vld [vmem:[%s2475_s3 + $0x8] sm:$0xff]  ;;  %v1965_v17 = vld [vmem:[%s2475_s3] sm:$0xff]  ;;  %v1973_v21 = vld [vmem:[%s2475_s3 + $0x18] sm:$0xff] }
   0xc   : > { %s2159_s23 = sshll.u32 %s2486_s22, 3  ;;  %2045 = vrcp.f32 %v2085_v2  ;;  %v1968_v15 = vld [vmem:[%s2475_s3 + $0x28] sm:$0xff]  ;;  %500 = vmatpush.bf16.msra.mxu0 %v1966_v14  ;;  %v1967_v18 = vld [vmem:[%s2475_s3 + $0x20] sm:$0xff]  ;;  %v1975_v22 = vld [vmem:[%s2475_s3 + $0x38] sm:$0xff]  ;;  %vm579_vm5 = vcmask 130048   ;;  %vm616_vm6 = vcmask 1043456  }
   0xd   : > { %s417_s26 = scalar_lea.vmem %s2472_s0, %s2159_s23  ;;  %v1970_v16 = vld [vmem:[%s2475_s3 + $0x48] sm:$0xff]  ;;  %535 = vmatpush.bf16.msra.mxu1 %v1968_v15  ;;  %v1969_v19 = vld [vmem:[%s2475_s3 + $0x40] sm:$0xff]  ;;  %v1972_v24 = vld [vmem:[%s2475_s3 + $0x10] sm:$0xff]  ;;  %s421_s15 = scalar_lea.vmem %s2473_s1, %s2159_s23  ;;  %vm599_vm7 = vcmask 64512   ;;  %vm966_vm11 = vcmask 523264  }
   0xe   : > { %v427_v0 = vld [vmem:[%s417_s26] sm:$0xff]  ;;  %570 = vmatpush.bf16.msra.mxu2 %v1970_v16  ;;  %v1974_v25 = vld [vmem:[%s2475_s3 + $0x30] sm:$0xff]  ;;  %v1977_v46 = vld [vmem:[%s2475_s3 + $0x58] sm:$0xff]  ;;  %s425_s30 = scalar_lea.vmem %s2484_s12, %s2159_s23 }
   0xf   : > { %v432_v1 = vsel %vm431_vm0, %v427_v0, 0.0  ;;  %v2016_v33 = vld [vmem:[%s2474_s2] ss:$0 sm:$0xff]  ;;  %v2017_v35 = vld [vmem:[%s2474_s2 + $0x1] ss:$0 sm:$0xff]  ;;  %v1976_v51 = vld [vmem:[%s2475_s3 + $0x50] sm:$0xff] }
  0x10   : > { %433 = vadd.xlane.f32.xlu0 %v432_v1  ;;  %501 = vmatpush.bf16.msra.mxu0 %v1965_v17  ;;  %v2019_v40 = vld [vmem:[%s2476_s4 + $0x2] ss:$0 sm:$0xff]  ;;  %v2018_v44 = vld [vmem:[%s2476_s4] ss:$0 sm:$0xff]  ;;  %v2020_v47 = vld [vmem:[%s2476_s4 + $0x4] ss:$0 sm:$0xff] }
  0x11   : > { %536 = vmatpush.bf16.msra.mxu1 %v1967_v18  ;;  %v2022_v60 = vld [vmem:[%s2476_s4 + $0x3] ss:$0 sm:$0xff] }
  0x12   : > { %v2046_v3 = vpop.eup %2045  ;;  %571 = vmatpush.bf16.msra.mxu2 %v1969_v19 }
  0x13   : > { %v436_v4 = vmul.f32 32.0, %v2046_v3  ;;  %vm440_vm1 = vweird.f32 %v2046_v3 }
  0x15   : > { %v437_v5 = vsub.f32 1.0, %v436_v4  ;;  %664 = vmatpush.bf16.msrb.mxu1 %v1973_v21 }
  0x16   : > { %699 = vmatpush.bf16.msrb.mxu2 %v1975_v22 }
  0x17   : > { %v438_v6 = vmul.f32 %v2046_v3, %v437_v5 }
  0x19   : > { %v439_v7 = vadd.f32 %v2046_v3, %v438_v6  ;;  %665 = vmatpush.bf16.msrb.mxu1 %v1972_v24  ;;  %v2021_v24 = vld [vmem:[%s2476_s4 + $0x1] ss:$0 sm:$0xff] }
  0x1a   : > { %700 = vmatpush.bf16.msrb.mxu2 %v1974_v25 }
  0x1b   : > { %v2166_v8 = vsel %vm440_vm1, %v2046_v3, %v439_v7  ;;  %v2243_v3 = vld [vmem:[%s421_s15] sm:$0xff] }
  0x83   : > { %v434_v9 = vpop.xlane.xlu0 %433 }
  0x84   : > { %v442_v10 = vmul.f32 %v2166_v8, %v434_v9  ;;  %v2023_v9 = vld [vmem:[%s2476_s4 + $0x5] ss:$0 sm:$0xff] }
  0x86   : > { %v443_v11 = vsub.f32 %v427_v0, %v442_v10 }
  0x88   : > { %v444_v12 = vmul.f32 %v443_v11, %v443_v11 }
  0x8a   : > { %v445_v13 = vsel %vm431_vm0, %v444_v12, 0.0 }
  0x8b   : > { %446 = vadd.xlane.f32.xlu0 %v445_v13 }
  0xfe   : > { %v447_v20 = vpop.xlane.xlu0 %446 }
  0xff   : > { %v448_v23 = vmul.f32 %v447_v20, %v2166_v8 }
 0x101   : > { %v449_v26 = vadd.f32 1e-12, %v448_v23 }
 0x103   : > { %2047 = vrsqrt.f32 %v449_v26  ;;  %vm456_vm3 = vweird.f32 %v449_v26 }
 0x109   : > { %v2048_v27 = vpop.eup %2047 }
 0x10a   : > { %v451_v28 = vmul.f32 %v2048_v27, %v449_v26  ;;  %vm457_vm2 = vweird.f32 %v2048_v27 }
 0x10b   : > { %vm458_vm4 = vmor %vm456_vm3, %vm457_vm2 }
 0x10c   : > { %v452_v29 = vmul.f32 %v2048_v27, %v451_v28 }
 0x10e   : > { %v453_v30 = vmul.f32 0.5, %v452_v29 }
 0x110   : > { %v454_v31 = vsub.f32 1.5, %v453_v30 }
 0x112   : > { %v455_v32 = vmul.f32 %v2048_v27, %v454_v31 }
 0x114   : > { %v459_v34 = vsel %vm458_vm4, %v2048_v27, %v455_v32  ;;  %v1971_v27 = vld [vmem:[%s2477_s5] sm:$0xff] }
 0x115   : > { %v460_v36 = vmul.f32 %v459_v34, %v443_v11 }
 0x117   : > { %v464_v37 = vmul.f32 %v2016_v33, %v460_v36 }
 0x119   : > { %v2207_v38 = vadd.f32 %v2017_v35, %v464_v37 }
 0x11b   : > { %v474_v39 = vpack.c.bf16 %v2207_v38, %v2207_v38 }
 0x11d   : > { %1689 = vmatmul.msk.bf16.vlgmr.msra.gmra.mxu0 %vm431_vm0, %v474_v39  ;;  %1703 = vmatmul.msk.bf16.vlgmr.msra.gmra.mxu1 %vm431_vm0, %v474_v39 }
 0x11e   : > { %1717 = vmatmul.msk.bf16.vlgmr.msra.gmra.mxu2 %vm431_vm0, %v474_v39 }
 0x12d   : > { %1733 = vmatmul.msk.bf16.vlgmr.msrb.gmra.mxu1 %vm431_vm0, %v474_v39 }
 0x12e   : > { %1747 = vmatmul.msk.bf16.vlgmr.msrb.gmra.mxu2 %vm431_vm0, %v474_v39 }
 0x19a   : > { %v503_v41 = vpop.f32.mrf.mxu0  ;;  %v538_v42 = vpop.f32.mrf.mxu1 }
 0x19b   : > { %v539_v43 = vadd.f32 %v2019_v40, %v538_v42  ;;  %v504_v49 = vadd.f32 %v2018_v44, %v503_v41 }
 0x19d   : > { %v578_v45 = vpack.c.bf16 %v539_v43, %v539_v43  ;;  %v577_v56 = vpack.c.bf16 %v504_v49, %v504_v49  ;;  %v1978_v43 = vld [vmem:[%s2477_s5 + $0x8] sm:$0xff] }
 0x19e   : > { %814 = vmatpush.bf16.msra.mxu2 %v1978_v43 }
 0x19f   : > { %v584_v48 = vsel %vm579_vm5, %v578_v45, 0 }
 0x1a0   : > { %593 = vmatpush.bf16.xpose.msra.mxu3 %v584_v48 }
 0x1a1   : > { %v573_v50 = vpop.f32.mrf.mxu2 }
 0x1a2   : > { %v574_v52 = vadd.f32 %v2020_v47, %v573_v50  ;;  %v505_v53 = vpop.f32.mrf.mxu0  ;;  %v540_v54 = vpop.f32.mrf.mxu1 }
 0x1a4   : > { %v611_v55 = vpack.c.bf16 %v574_v52, %v574_v52 }
 0x1a6   : > { %v618_v57 = vsel %vm616_vm6, %v611_v55, 0 }
 0x1a7   : > { %627 = vmatpush.bf16.msrb.mxu0 %v618_v57  ;;  %1718 = vmatmul.msk.bf16.vlgmr.msra.gmra.mxu3 %vm579_vm5, %v577_v56 }
 0x1a8   : > { %734 = vmatpush.bf16.msrb.mxu3 %v1977_v46 }
 0x1a9   : > { %v575_v58 = vpop.f32.mrf.mxu2 }
 0x1aa   : > { %v667_v59 = vpop.f32.mrf.mxu1 }
 0x1ab   : > { %v668_v25 = vadd.f32 %v2021_v24, %v667_v59 }
 0x1ac   : > { %735 = vmatpush.bf16.msrb.mxu3 %v1976_v51  ;;  %v2024_v51 = vld [vmem:[%s2481_s9] ss:$0 sm:$0xff] }
 0x1ad   : > { %v741_v26 = vpack.c.bf16 %v668_v25, %v668_v25 }
 0x1b0   : > { %836 = vmatpush.bf16.msra.mxu3 %v1971_v27 }
 0x1b1   : > { %v702_v61 = vpop.f32.mrf.mxu2 }
 0x1b2   : > { %v703_v62 = vadd.f32 %v2022_v60, %v702_v61  ;;  %v669_v63 = vpop.f32.mrf.mxu1 }
 0x1b3   : > { %v1980_v63 = vld [vmem:[%s2478_s6 + $0x8] sm:$0xff] }
 0x1b4   : > { %v742_v0 = vpack.c.bf16 %v703_v62, %v703_v62 }
 0x1b6   : > { %v747_v1 = vsel %vm579_vm5, %v742_v0, 0 }
 0x1b7   : > { %756 = vmatpush.bf16.xpose.msra.mxu0 %v747_v1  ;;  %1761 = vmatmul.msk.bf16.vlgmr.msrb.gmra.mxu3 %vm431_vm0, %v474_v39 }
 0x1b9   : > { %v704_v2 = vpop.f32.mrf.mxu2 }
 0x22a   : > { %v595_v4 = vpop.f32.mrf.mxu3 }
 0x22b   : > { %v596_v5 = vadd.f32 %v595_v4, %v2243_v3 }
 0x22d   : > { %v600_v6 = vsel %vm599_vm7, %v596_v5, -inf }
 0x22e   : > { %601 = vmax.xlane.f32.xlu1 %v600_v6 }
 0x232   : > { %v597_v7 = vpop.f32.mrf.mxu3 }
 0x23a   : > { %v737_v10 = vpop.f32.mrf.mxu3 }
 0x23b   : > { %v738_v11 = vadd.f32 %v2023_v9, %v737_v10 }
 0x23d   : > { %v773_v12 = vpack.c.bf16 %v738_v11, %v738_v11  ;;  %v2025_v11 = vld [vmem:[%s2481_s9 + $0x1] ss:$0 sm:$0xff] }
 0x23f   : > { %v779_v13 = vsel %vm616_vm6, %v773_v12, 0 }
 0x240   : > { %788 = vmatpush.bf16.msra.mxu1 %v779_v13  ;;  %v2026_v13 = vld [vmem:[%s2481_s9 + $0x2] ss:$0 sm:$0xff] }
 0x242   : > { %v739_v14 = vpop.f32.mrf.mxu3 }
 0x2a1   : > { %v602_v15 = vpop.xlane.xlu1 %601 }
 0x2a2   : > { %v603_v16 = vsub.f32 %v596_v5, %v602_v15 }
 0x2a4   : > { %v604_v17 = vmul.f32 1.442695, %v603_v16 }
 0x2a6   : > { %2049 = vpow2.f32 %v604_v17 }
 0x2ac   : > { %v2050_v18 = vpop.eup %2049 }
 0x2ad   : > { %v606_v19 = vsel %vm599_vm7, %v2050_v18, 0.0 }
 0x2ae   : > { %607 = vadd.xlane.f32.xlu1 %v606_v19  ;;  %v1983_v19 = vld [vmem:[%s2479_s7 + $0x10] sm:$0xff] }
 0x321   : > { %v608_v20 = vpop.xlane.xlu1 %607 }
 0x322   : > { %2051 = vrcp.f32 %v608_v20  ;;  %v1982_v20 = vld [vmem:[%s2479_s7 + $0x8] sm:$0xff] }
 0x328   : > { %v2052_v21 = vpop.eup %2051 }
 0x329   : > { %v610_v22 = vmul.f32 %v2052_v21, %v2050_v18  ;;  %v1984_v18 = vld [vmem:[%s2479_s7 + $0x18] sm:$0xff]  ;;  %v1981_v21 = vld [vmem:[%s2479_s7] sm:$0xff] }
 0x32a   : > { %974 = vmatpush.bf16.msrb.mxu1 %v1984_v18 }
 0x32b   : > { %v612_v23 = vpack.c.bf16 %v610_v22, %v610_v22  ;;  %v2027_v22 = vld [vmem:[%s2480_s8] ss:$0 sm:$0xff] }
 0x32d   : > { %1719 = vmatmul.msk.bf16.vlgmr.msrb.gmra.mxu0 %vm599_vm7, %v612_v23 }
 0x32e   : > { %912 = vmatpush.bf16.msrb.mxu0 %v1980_v63  ;;  %975 = vmatpush.bf16.msrb.mxu1 %v1983_v19 }
 0x332   : > { %976 = vmatpush.bf16.msrb.mxu1 %v1982_v20  ;;  %v2032_v20 = vld [vmem:[%s2476_s4 + $0x6] ss:$0 sm:$0xff] }
 0x336   : > { %977 = vmatpush.bf16.msrb.mxu1 %v1981_v21 }
 0x33d   : > { %1762 = vmatmul.msk.bf16.vlgmr.msra.gmra.mxu0 %vm579_vm5, %v741_v26 }
 0x3aa   : > { %v629_v28 = vpop.f32.mrf.mxu0 }
 0x3ab   : > { %v635_v29 = vpack.c.bf16 %v629_v28, %v629_v28 }
 0x3ad   : > { %1775 = vmatmul.msk.bf16.vlgmr.msra.gmra.mxu3 %vm579_vm5, %v635_v29 }
 0x3b2   : > { %v631_v30 = vpop.f32.mrf.mxu0 }
 0x3ba   : > { %v758_v31 = vpop.f32.mrf.mxu0 }
 0x3bb   : > { %v759_v32 = vadd.f32 %v758_v31, %v2243_v3 }
 0x3bd   : > { %v762_v33 = vsel %vm599_vm7, %v759_v32, -inf }
 0x3be   : > { %763 = vmax.xlane.f32.xlu2 %v762_v33 }
 0x3c2   : > { %v760_v34 = vpop.f32.mrf.mxu0 }
 0x430   : > { %v838_v35 = vpop.f32.mrf.mxu3 }
 0x431   : > { %v764_v36 = vpop.xlane.xlu2 %763 }
 0x432   : > { %v765_v37 = vsub.f32 %v759_v32, %v764_v36  ;;  %v2028_v36 = vld [vmem:[%s2481_s9 + $0x3] ss:$0 sm:$0xff] }
 0x434   : > { %v766_v39 = vmul.f32 1.442695, %v765_v37 }
 0x436   : > { %2053 = vpow2.f32 %v766_v39 }
 0x438   : > { %v840_v40 = vpop.f32.mrf.mxu3 }
 0x43c   : > { %v2054_v41 = vpop.eup %2053 }
 0x43d   : > { %v768_v42 = vsel %vm599_vm7, %v2054_v41, 0.0 }
 0x43e   : > { %769 = vadd.xlane.f32.xlu2 %v768_v42 }
 0x4b1   : > { %v770_v44 = vpop.xlane.xlu2 %769 }
 0x4b2   : > { %2055 = vrcp.f32 %v770_v44 }
 0x4b8   : > { %v2056_v45 = vpop.eup %2055 }
 0x4b9   : > { %v772_v46 = vmul.f32 %v2056_v45, %v2054_v41 }
 0x4bb   : > { %v774_v47 = vpack.c.bf16 %v772_v46, %v772_v46 }
 0x4bd   : > { %1763 = vmatmul.msk.bf16.vlgmr.msra.gmra.mxu1 %vm599_vm7, %v774_v47 }
 0x53a   : > { %v790_v48 = vpop.f32.mrf.mxu1 }
 0x53b   : > { %v797_v49 = vpack.c.bf16 %v790_v48, %v790_v48  ;;  %v1986_v48 = vld [vmem:[%s2475_s3 + $0x68] sm:$0xff] }
 0x53c   : > { %1050 = vmatpush.bf16.msrb.mxu2 %v1986_v48 }
 0x53d   : > { %1770 = vmatmul.msk.bf16.vlgmr.msra.gmra.mxu2 %vm579_vm5, %v797_v49  ;;  %v1988_v49 = vld [vmem:[%s2475_s3 + $0x88] sm:$0xff] }
 0x53e   : > { %1085 = vmatpush.bf16.msrb.mxu3 %v1988_v49 }
 0x542   : > { %v792_v50 = vpop.f32.mrf.mxu1 }
 0x543   : > { %v1990_v50 = vld [vmem:[%s2475_s3 + $0xa8] sm:$0xff] }
 0x5c0   : > { %v816_v52 = vpop.f32.mrf.mxu2 }
 0x5c1   : > { %v839_v53 = vadd.f32 %v838_v35, %v816_v52  ;;  %v1987_v52 = vld [vmem:[%s2475_s3 + $0x80] sm:$0xff] }
 0x5c2   : > { %1086 = vmatpush.bf16.msrb.mxu3 %v1987_v52 }
 0x5c3   : > { %v846_v54 = vadd.f32 %v2024_v51, %v839_v53  ;;  %v1985_v51 = vld [vmem:[%s2475_s3 + $0x60] sm:$0xff] }
 0x5c4   : > { %v1989_v53 = vld [vmem:[%s2475_s3 + $0xa0] sm:$0xff]  ;;  %1051 = vmatpush.bf16.msrb.mxu2 %v1985_v51 }
 0x5c5   : > { %v847_v55 = vadd.f32 %v846_v54, %v2207_v38  ;;  %v1979_v38 = vld [vmem:[%s2478_s6] sm:$0xff] }
 0x5c6   : > { %913 = vmatpush.bf16.msrb.mxu0 %v1979_v38 }
 0x5c7   : > { %v852_v56 = vsel %vm431_vm0, %v847_v55, 0.0 }
 0x5c8   : > { %853 = vadd.xlane.f32.xlu0 %v852_v56  ;;  %v818_v57 = vpop.f32.mrf.mxu2  ;;  %v1995_v56 = vld [vmem:[%s2475_s3 + $0x98] sm:$0xff] }
 0x5ca   : > { %1120 = vmatpush.bf16.msra.mxu0 %v1990_v50 }
 0x5ce   : > { %1121 = vmatpush.bf16.msra.mxu0 %v1989_v53 }
 0x63b   : > { %v854_v58 = vpop.xlane.xlu0 %853 }
 0x63c   : > { %v855_v59 = vmul.f32 %v854_v58, %v2166_v8  ;;  %v1992_v58 = vld [vmem:[%s2475_s3 + $0x70] sm:$0xff] }
 0x63e   : > { %v856_v60 = vsub.f32 %v847_v55, %v855_v59  ;;  %v1993_v55 = vld [vmem:[%s2475_s3 + $0x78] sm:$0xff]  ;;  %v1994_v59 = vld [vmem:[%s2475_s3 + $0x90] sm:$0xff] }
 0x63f   : > { %1212 = vmatpush.bf16.msra.mxu3 %v1993_v55 }
 0x640   : > { %v857_v61 = vmul.f32 %v856_v60, %v856_v60 }
 0x642   : > { %v858_v62 = vsel %vm431_vm0, %v857_v61, 0.0 }
 0x643   : > { %859 = vadd.xlane.f32.xlu1 %v858_v62  ;;  %1213 = vmatpush.bf16.msra.mxu3 %v1992_v58  ;;  %v2035_v58 = vld [vmem:[%s2476_s4 + $0x7] ss:$0 sm:$0xff] }
 0x6b6   : > { %v860_v0 = vpop.xlane.xlu1 %859 }
 0x6b7   : > { %v861_v1 = vmul.f32 %v860_v0, %v2166_v8 }
 0x6b9   : > { %v862_v2 = vadd.f32 1e-12, %v861_v1 }
 0x6bb   : > { %2057 = vrsqrt.f32 %v862_v2  ;;  %vm869_vm9 = vweird.f32 %v862_v2 }
 0x6c1   : > { %v2058_v4 = vpop.eup %2057 }
 0x6c2   : > { %v864_v5 = vmul.f32 %v2058_v4, %v862_v2  ;;  %vm870_vm8 = vweird.f32 %v2058_v4  ;;  %v2029_v2 = vld [vmem:[%s2481_s9 + $0x4] ss:$0 sm:$0xff] }
 0x6c3   : > { %vm871_vm10 = vmor %vm869_vm9, %vm870_vm8 }
 0x6c4   : > { %v865_v6 = vmul.f32 %v2058_v4, %v864_v5  ;;  %v2030_v5 = vld [vmem:[%s2481_s9 + $0x5] ss:$0 sm:$0xff] }
 0x6c6   : > { %v866_v7 = vmul.f32 0.5, %v865_v6 }
 0x6c8   : > { %v867_v9 = vsub.f32 1.5, %v866_v7 }
 0x6ca   : > { %v868_v10 = vmul.f32 %v2058_v4, %v867_v9 }
 0x6cc   : > { %v872_v12 = vsel %vm871_vm10, %v2058_v4, %v868_v10 }
 0x6cd   : > { %v873_v14 = vmul.f32 %v872_v12, %v856_v60 }
 0x6cf   : > { %v877_v15 = vmul.f32 %v2025_v11, %v873_v14  ;;  %v2031_v11 = vld [vmem:[%s2476_s4 + $0xa] ss:$0 sm:$0xff]  ;;  %v2033_v14 = vld [vmem:[%s2476_s4 + $0x8] ss:$0 sm:$0xff] }
 0x6d1   : > { %v881_v16 = vadd.f32 %v2026_v13, %v877_v15 }
 0x6d3   : > { %v886_v17 = vpack.c.bf16 %v881_v16, %v881_v16 }
 0x6d5   : > { %1786 = vmatmul.msk.bf16.vlgmr.msrb.gmra.mxu0 %vm431_vm0, %v886_v17 }
 0x6d6   : > { %1247 = vmatpush.bf16.msrb.mxu0 %v1995_v56 }
 0x6da   : > { %1248 = vmatpush.bf16.msrb.mxu0 %v1994_v59 }
 0x752   : > { %v915_v23 = vpop.f32.mrf.mxu0 }
 0x753   : > { %v916_v24 = vadd.f32 %v2027_v22, %v915_v23  ;;  %v1997_v23 = vld [vmem:[%s2475_s3 + $0xb8] sm:$0xff] }
 0x755   : > { %v920_v25 = vmul.f32 0.044715, %v916_v24  ;;  %v919_v32 = vmul.f32 0.5, %v916_v24 }
 0x757   : > { %v921_v26 = vmul.f32 %v920_v25, %v916_v24 }
 0x759   : > { %v922_v27 = vmul.f32 %v921_v26, %v916_v24  ;;  %v1996_v26 = vld [vmem:[%s2475_s3 + $0xb0] sm:$0xff] }
 0x75a   : > { %v917_v28 = vpop.f32.mrf.mxu0 }
 0x75b   : > { %v923_v29 = vadd.f32 %v922_v27, %v916_v24 }
 0x75d   : > { %v924_v30 = vmul.f32 0.7978846, %v923_v29  ;;  %v2034_v29 = vld [vmem:[%s2476_s4 + $0x9] ss:$0 sm:$0xff] }
 0x75f   : > { %2059 = vtanh.f32 %v924_v30 }
 0x765   : > { %v2060_v31 = vpop.eup %2059 }
 0x766   : > { %v926_v33 = vadd.f32 1.0, %v2060_v31 }
 0x768   : > { %v927_v34 = vmul.f32 %v926_v33, %v919_v32 }
 0x76a   : > { %v936_v35 = vpack.c.bf16 %v927_v34, %v927_v34 }
 0x76c   : > { %1804 = vmatmul.msk.bf16.vlgmr.msrb.gmra.mxu1 %vm966_vm11, %v936_v35 }
 0x7e9   : > { %v979_v37 = vpop.f32.mrf.mxu1 }
 0x7ea   : > { %v980_v39 = vadd.f32 %v2028_v36, %v979_v37 }
 0x7ec   : > { %v983_v40 = vadd.f32 %v980_v39, %v881_v16 }
 0x7ee   : > { %v988_v41 = vsel %vm431_vm0, %v983_v40, 0.0 }
 0x7ef   : > { %989 = vadd.xlane.f32.xlu2 %v988_v41 }
 0x7f1   : > { %v981_v42 = vpop.f32.mrf.mxu1 }
 0x862   : > { %v990_v43 = vpop.xlane.xlu2 %989 }
 0x863   : > { %v991_v44 = vmul.f32 %v990_v43, %v2166_v8  ;;  %v2036_v43 = vld [vmem:[%s2476_s4 + $0xb] ss:$0 sm:$0xff] }
 0x865   : > { %v992_v45 = vsub.f32 %v983_v40, %v991_v44 }
 0x867   : > { %v993_v46 = vmul.f32 %v992_v45, %v992_v45 }
 0x869   : > { %v994_v47 = vsel %vm431_vm0, %v993_v46, 0.0 }
 0x86a   : > { %995 = vadd.xlane.f32.xlu0 %v994_v47 }
 0x8dd   : > { %v996_v54 = vpop.xlane.xlu0 %995 }
 0x8de   : > { %v997_v57 = vmul.f32 %v996_v54, %v2166_v8 }
 0x8e0   : > { %v998_v60 = vadd.f32 1e-12, %v997_v57 }
 0x8e2   : > { %2061 = vrsqrt.f32 %v998_v60  ;;  %vm1005_vm13 = vweird.f32 %v998_v60 }
 0x8e8   : > { %v2062_v61 = vpop.eup %2061 }
 0x8e9   : > { %v1000_v62 = vmul.f32 %v2062_v61, %v998_v60  ;;  %vm1006_vm12 = vweird.f32 %v2062_v61 }
 0x8ea   : > { %vm1007_vm14 = vmor %vm1005_vm13, %vm1006_vm12 }
 0x8eb   : > { %v1001_v63 = vmul.f32 %v2062_v61, %v1000_v62 }
 0x8ed   : > { %v1002_v38 = vmul.f32 0.5, %v1001_v63 }
 0x8ef   : > { %v1003_v0 = vsub.f32 1.5, %v1002_v38 }
 0x8f1   : > { %v1004_v1 = vmul.f32 %v2062_v61, %v1003_v0 }
 0x8f3   : > { %v1008_v4 = vsel %vm1007_vm14, %v2062_v61, %v1004_v1  ;;  %v1991_v61 = vld [vmem:[%s2477_s5 + $0x10] sm:$0xff] }
 0x8f4   : > { %v1009_v6 = vmul.f32 %v1008_v4, %v992_v45 }
 0x8f6   : > { %v1013_v7 = vmul.f32 %v2029_v2, %v1009_v6 }
 0x8f8   : > { %v2349_v9 = vadd.f32 %v2030_v5, %v1013_v7 }
 0x8fa   : > { %v1023_v10 = vpack.c.bf16 %v2349_v9, %v2349_v9 }
 0x8fc   : > { %1820 = vmatmul.msk.bf16.vlgmr.msrb.gmra.mxu2 %vm431_vm0, %v1023_v10  ;;  %1834 = vmatmul.msk.bf16.vlgmr.msrb.gmra.mxu3 %vm431_vm0, %v1023_v10 }
 0x8fd   : > { %1848 = vmatmul.msk.bf16.vlgmr.msra.gmra.mxu0 %vm431_vm0, %v1023_v10 }
 0x90c   : > { %1866 = vmatmul.msk.bf16.vlgmr.msra.gmra.mxu3 %vm431_vm0, %v1023_v10 }
 0x90d   : > { %1880 = vmatmul.msk.bf16.vlgmr.msrb.gmra.mxu0 %vm431_vm0, %v1023_v10 }
 0x97a   : > { %v1123_v12 = vpop.f32.mrf.mxu0 }
 0x97b   : > { %v1124_v13 = vadd.f32 %v2031_v11, %v1123_v12 }
 0x97d   : > { %v1159_v15 = vpack.c.bf16 %v1124_v13, %v1124_v13 }
 0x97f   : > { %v1165_v16 = vsel %vm616_vm6, %v1159_v15, 0  ;;  %v1053_v17 = vpop.f32.mrf.mxu2  ;;  %v1088_v18 = vpop.f32.mrf.mxu3 }
 0x980   : > { %v1089_v19 = vadd.f32 %v2033_v14, %v1088_v18  ;;  %1174 = vmatpush.bf16.msra.mxu2 %v1165_v16  ;;  %v1054_v25 = vadd.f32 %v2032_v20, %v1053_v17  ;;  %v1998_v14 = vld [vmem:[%s2477_s5 + $0x18] sm:$0xff] }
 0x981   : > { %1362 = vmatpush.bf16.msra.mxu0 %v1998_v14 }
 0x982   : > { %v1128_v21 = vpack.c.bf16 %v1089_v19, %v1089_v19  ;;  %v1125_v22 = vpop.f32.mrf.mxu0  ;;  %v1127_v30 = vpack.c.bf16 %v1054_v25, %v1054_v25 }
 0x984   : > { %v1133_v24 = vsel %vm579_vm5, %v1128_v21, 0  ;;  %v2037_v21 = vld [vmem:[%s2481_s9 + $0x6] ss:$0 sm:$0xff] }
 0x985   : > { %1142 = vmatpush.bf16.xpose.msra.mxu1 %v1133_v24 }
 0x987   : > { %v1055_v27 = vpop.f32.mrf.mxu2  ;;  %v1090_v28 = vpop.f32.mrf.mxu3 }
 0x98a   : > { %v1250_v31 = vpop.f32.mrf.mxu0 }
 0x98b   : > { %v1251_v32 = vadd.f32 %v2034_v29, %v1250_v31 }
 0x98c   : > { %1849 = vmatmul.msk.bf16.vlgmr.msra.gmra.mxu1 %vm579_vm5, %v1127_v30 }
 0x98d   : > { %1282 = vmatpush.bf16.msrb.mxu1 %v1997_v23  ;;  %v1290_v33 = vpack.c.bf16 %v1251_v32, %v1251_v32 }
 0x98f   : > { %v1295_v34 = vsel %vm579_vm5, %v1290_v33, 0  ;;  %v1215_v35 = vpop.f32.mrf.mxu3  ;;  %v2000_v33 = vld [vmem:[%s2478_s6 + $0x18] sm:$0xff] }
 0x990   : > { %1304 = vmatpush.bf16.xpose.msrb.mxu2 %v1295_v34  ;;  %v1216_v59 = vadd.f32 %v2035_v58, %v1215_v35 }
 0x991   : > { %1283 = vmatpush.bf16.msrb.mxu1 %v1996_v26 }
 0x992   : > { %v1252_v36 = vpop.f32.mrf.mxu0  ;;  %v1289_v60 = vpack.c.bf16 %v1216_v59, %v1216_v59 }
 0x995   : > { %1384 = vmatpush.bf16.msra.mxu1 %v1991_v61 }
 0x997   : > { %v1217_v37 = vpop.f32.mrf.mxu3 }
 0x99c   : > { %1894 = vmatmul.msk.bf16.vlgmr.msrb.gmra.mxu1 %vm431_vm0, %v1023_v10 }
 0xa09   : > { %v1144_v39 = vpop.f32.mrf.mxu1 }
 0xa0a   : > { %v1145_v40 = vadd.f32 %v1144_v39, %v2243_v3 }
 0xa0c   : > { %v1148_v41 = vsel %vm599_vm7, %v1145_v40, -inf }
 0xa0d   : > { %1149 = vmax.xlane.f32.xlu1 %v1148_v41 }
 0xa11   : > { %v1146_v42 = vpop.f32.mrf.mxu1 }
 0xa19   : > { %v1285_v44 = vpop.f32.mrf.mxu1 }
 0xa1a   : > { %v1286_v45 = vadd.f32 %v2036_v43, %v1285_v44  ;;  %v2038_v44 = vld [vmem:[%s2481_s9 + $0x7] ss:$0 sm:$0xff] }
 0xa1c   : > { %v1321_v46 = vpack.c.bf16 %v1286_v45, %v1286_v45 }
 0xa1e   : > { %v1327_v47 = vsel %vm616_vm6, %v1321_v46, 0  ;;  %v2039_v46 = vld [vmem:[%s2481_s9 + $0x8] ss:$0 sm:$0xff] }
 0xa1f   : > { %1336 = vmatpush.bf16.msrb.mxu3 %v1327_v47 }
 0xa21   : > { %v1287_v48 = vpop.f32.mrf.mxu1 }
 0xa80   : > { %v1150_v49 = vpop.xlane.xlu1 %1149 }
 0xa81   : > { %v1151_v50 = vsub.f32 %v1145_v40, %v1150_v49 }
 0xa83   : > { %v1152_v51 = vmul.f32 1.442695, %v1151_v50 }
 0xa85   : > { %2063 = vpow2.f32 %v1152_v51  ;;  %v2004_v51 = vld [vmem:[%s2479_s7 + $0x38] sm:$0xff] }
 0xa86   : > { %1525 = vmatpush.bf16.msra.mxu3 %v2004_v51 }
 0xa8b   : > { %v2064_v52 = vpop.eup %2063 }
 0xa8c   : > { %v1154_v53 = vsel %vm599_vm7, %v2064_v52, 0.0 }
 0xa8d   : > { %1155 = vadd.xlane.f32.xlu2 %v1154_v53  ;;  %v2002_v53 = vld [vmem:[%s2479_s7 + $0x28] sm:$0xff] }
 0xb00   : > { %v1156_v54 = vpop.xlane.xlu2 %1155 }
 0xb01   : > { %2065 = vrcp.f32 %v1156_v54  ;;  %v2001_v54 = vld [vmem:[%s2479_s7 + $0x20] sm:$0xff] }
 0xb07   : > { %v2066_v55 = vpop.eup %2065 }
 0xb08   : > { %v1158_v56 = vmul.f32 %v2066_v55, %v2064_v52  ;;  %v2003_v52 = vld [vmem:[%s2479_s7 + $0x30] sm:$0xff]  ;;  %v2040_v55 = vld [vmem:[%s2480_s8 + $0x1] ss:$0 sm:$0xff] }
 0xb09   : > { %1526 = vmatpush.bf16.msra.mxu3 %v2003_v52 }
 0xb0a   : > { %v1160_v57 = vpack.c.bf16 %v1158_v56, %v1158_v56 }
 0xb0c   : > { %1850 = vmatmul.msk.bf16.vlgmr.msra.gmra.mxu2 %vm599_vm7, %v1160_v57 }
 0xb0d   : > { %1463 = vmatpush.bf16.msra.mxu2 %v2000_v33  ;;  %1527 = vmatpush.bf16.msra.mxu3 %v2002_v53 }
 0xb11   : > { %1528 = vmatpush.bf16.msra.mxu3 %v2001_v54 }
 0xb1c   : > { %1895 = vmatmul.msk.bf16.vlgmr.msrb.gmra.mxu2 %vm579_vm5, %v1289_v60 }
 0xb8f   : > { %v1176_v62 = vpop.f32.mrf.mxu2 }
 0xb90   : > { %v1183_v63 = vpack.c.bf16 %v1176_v62, %v1176_v62 }
 0xb92   : > { %1908 = vmatmul.msk.bf16.vlgmr.msra.gmra.mxu1 %vm579_vm5, %v1183_v63 }
 0xb97   : > { %v1178_v38 = vpop.f32.mrf.mxu2 }
 0xb9f   : > { %v1306_v0 = vpop.f32.mrf.mxu2 }
 0xba0   : > { %v1307_v1 = vadd.f32 %v1306_v0, %v2243_v3 }
 0xba2   : > { %v1310_v2 = vsel %vm599_vm7, %v1307_v1, -inf }
 0xba3   : > { %1311 = vmax.xlane.f32.xlu0 %v1310_v2 }
 0xba7   : > { %v1308_v4 = vpop.f32.mrf.mxu2 }
 0xc0f   : > { %v1386_v5 = vpop.f32.mrf.mxu1 }
 0xc16   : > { %v1312_v6 = vpop.xlane.xlu0 %1311 }
 0xc17   : > { %v1313_v7 = vsub.f32 %v1307_v1, %v1312_v6  ;;  %v1388_v10 = vpop.f32.mrf.mxu1 }
 0xc19   : > { %v1314_v11 = vmul.f32 1.442695, %v1313_v7 }
 0xc1b   : > { %2067 = vpow2.f32 %v1314_v11 }
 0xc21   : > { %v2068_v12 = vpop.eup %2067 }
 0xc22   : > { %v1316_v13 = vsel %vm599_vm7, %v2068_v12, 0.0 }
 0xc23   : > { %1317 = vadd.xlane.f32.xlu1 %v1316_v13 }
 0xc96   : > { %v1318_v3 = vpop.xlane.xlu1 %1317 }
 0xc97   : > { %2069 = vrcp.f32 %v1318_v3 }
 0xc9d   : > { %v2070_v15 = vpop.eup %2069 }
 0xc9e   : > { %v1320_v16 = vmul.f32 %v2070_v15, %v2068_v12 }
 0xca0   : > { %v1322_v17 = vpack.c.bf16 %v1320_v16, %v1320_v16 }
 0xca2   : > { %1896 = vmatmul.msk.bf16.vlgmr.msrb.gmra.mxu3 %vm599_vm7, %v1322_v17  ;;  %v2006_v17 = vld [vmem:[%s2482_s10 + $0x8] sm:$0xff] }
 0xca3   : > { %1599 = vmatpush.bf16.msrb.mxu0 %v2006_v17 }
 0xd25   : > { %v1338_v18 = vpop.f32.mrf.mxu3 }
 0xd26   : > { %v1345_v19 = vpack.c.bf16 %v1338_v18, %v1338_v18  ;;  %v2005_v18 = vld [vmem:[%s2482_s10] sm:$0xff] }
 0xd27   : > { %1600 = vmatpush.bf16.msrb.mxu0 %v2005_v18 }
 0xd28   : > { %1903 = vmatmul.msk.bf16.vlgmr.msra.gmra.mxu0 %vm579_vm5, %v1345_v19 }
 0xd2d   : > { %v1340_v20 = vpop.f32.mrf.mxu3 }
 0xda5   : > { %v1364_v22 = vpop.f32.mrf.mxu0 }
 0xda6   : > { %v1387_v23 = vadd.f32 %v1386_v5, %v1364_v22  ;;  %v2041_v5 = vld [vmem:[%s2481_s9 + $0x9] ss:$0 sm:$0xff] }
 0xda8   : > { %v1395_v24 = vadd.f32 %v2037_v21, %v1387_v23 }
 0xdaa   : > { %v1396_v25 = vadd.f32 %v1395_v24, %v2349_v9  ;;  %v1999_v9 = vld [vmem:[%s2478_s6 + $0x10] sm:$0xff] }
 0xdab   : > { %1464 = vmatpush.bf16.msra.mxu2 %v1999_v9  ;;  %v2044_v9 = vld [vmem:[%s2483_s11] ss:$0 sm:$0xff] }
 0xdac   : > { %v1401_v26 = vsel %vm431_vm0, %v1396_v25, 0.0 }
 0xdad   : > { %1402 = vadd.xlane.f32.xlu2 %v1401_v26  ;;  %v1366_v27 = vpop.f32.mrf.mxu0 }
 0xe20   : > { %v1403_v28 = vpop.xlane.xlu2 %1402 }
 0xe21   : > { %v1404_v29 = vmul.f32 %v1403_v28, %v2166_v8  ;;  %v2042_v28 = vld [vmem:[%s2481_s9 + $0xa] ss:$0 sm:$0xff] }
 0xe23   : > { %v1405_v30 = vsub.f32 %v1396_v25, %v1404_v29 }
 0xe25   : > { %v1406_v31 = vmul.f32 %v1405_v30, %v1405_v30 }
 0xe27   : > { %v1407_v32 = vsel %vm431_vm0, %v1406_v31, 0.0 }
 0xe28   : > { %1408 = vadd.xlane.f32.xlu0 %v1407_v32 }
 0xe9b   : > { %v1409_v34 = vpop.xlane.xlu0 %1408 }
 0xe9c   : > { %v1410_v35 = vmul.f32 %v1409_v34, %v2166_v8 }
 0xe9e   : > { %v1411_v36 = vadd.f32 1e-12, %v1410_v35 }
 0xea0   : > { %2071 = vrsqrt.f32 %v1411_v36  ;;  %vm1418_vm1 = vweird.f32 %v1411_v36 }
 0xea6   : > { %v2072_v37 = vpop.eup %2071 }
 0xea7   : > { %v1413_v39 = vmul.f32 %v2072_v37, %v1411_v36  ;;  %vm1419_vm15 = vweird.f32 %v2072_v37 }
 0xea8   : > { %vm1420_vm2 = vmor %vm1418_vm1, %vm1419_vm15 }
 0xea9   : > { %v1414_v40 = vmul.f32 %v2072_v37, %v1413_v39 }
 0xeab   : > { %v1415_v41 = vmul.f32 0.5, %v1414_v40 }
 0xead   : > { %v1416_v42 = vsub.f32 1.5, %v1415_v41 }
 0xeaf   : > { %v1417_v43 = vmul.f32 %v2072_v37, %v1416_v42 }
 0xeb1   : > { %v1421_v45 = vsel %vm1420_vm2, %v2072_v37, %v1417_v43 }
 0xeb2   : > { %v1422_v47 = vmul.f32 %v1421_v45, %v1405_v30 }
 0xeb4   : > { %v1426_v48 = vmul.f32 %v2038_v44, %v1422_v47 }
 0xeb6   : > { %v1430_v49 = vadd.f32 %v2039_v46, %v1426_v48 }
 0xeb8   : > { %v1436_v50 = vpack.c.bf16 %v1430_v49, %v1430_v49 }
 0xeba   : > { %1925 = vmatmul.msk.bf16.vlgmr.msra.gmra.mxu2 %vm431_vm0, %v1436_v50 }
 0xf3d   : > { %v1466_v56 = vpop.f32.mrf.mxu2 }
 0xf3e   : > { %v1467_v57 = vadd.f32 %v2040_v55, %v1466_v56 }
 0xf40   : > { %v1471_v58 = vmul.f32 0.044715, %v1467_v57  ;;  %v1470_v0 = vmul.f32 0.5, %v1467_v57 }
 0xf42   : > { %v1472_v59 = vmul.f32 %v1471_v58, %v1467_v57 }
 0xf44   : > { %v1473_v60 = vmul.f32 %v1472_v59, %v1467_v57 }
 0xf45   : > { %v1468_v61 = vpop.f32.mrf.mxu2 }
 0xf46   : > { %v1474_v62 = vadd.f32 %v1473_v60, %v1467_v57 }
 0xf48   : > { %v1475_v63 = vmul.f32 0.7978846, %v1474_v62 }
 0xf4a   : > { %2073 = vtanh.f32 %v1475_v63 }
 0xf50   : > { %v2074_v38 = vpop.eup %2073 }
 0xf51   : > { %v1477_v1 = vadd.f32 1.0, %v2074_v38 }
 0xf53   : > { %v1478_v2 = vmul.f32 %v1477_v1, %v1470_v0 }
 0xf55   : > { %v1488_v4 = vpack.c.bf16 %v1478_v2, %v1478_v2 }
 0xf57   : > { %1951 = vmatmul.msk.bf16.vlgmr.msra.gmra.mxu3 %vm966_vm11, %v1488_v4 }
 0xfda   : > { %v1530_v6 = vpop.f32.mrf.mxu3 }
 0xfdb   : > { %v1531_v7 = vadd.f32 %v2041_v5, %v1530_v6 }
 0xfdd   : > { %v1534_v10 = vadd.f32 %v1531_v7, %v1430_v49 }
 0xfdf   : > { %v1539_v11 = vsel %vm431_vm0, %v1534_v10, 0.0 }
 0xfe0   : > { %1540 = vadd.xlane.f32.xlu1 %v1539_v11 }
 0xfe2   : > { %v1532_v12 = vpop.f32.mrf.mxu3 }
0x1053   : > { %v1541_v13 = vpop.xlane.xlu1 %1540 }
0x1054   : > { %v1542_v14 = vmul.f32 %v1541_v13, %v2166_v8 }
0x1056   : > { %v1543_v3 = vsub.f32 %v1534_v10, %v1542_v14 }
0x1058   : > { %v1544_v15 = vmul.f32 %v1543_v3, %v1543_v3 }
0x105a   : > { %v1545_v16 = vsel %vm431_vm0, %v1544_v15, 0.0 }
0x105b   : > { %1546 = vadd.xlane.f32.xlu2 %v1545_v16 }
0x10ce   : > { %v1547_v19 = vpop.xlane.xlu2 %1546 }
0x10cf   : > { %v1548_v20 = vmul.f32 %v1547_v19, %v2166_v8  ;;  %v2043_v8 = vld [vmem:[%s2481_s9 + $0xb] ss:$0 sm:$0xff] }
0x10d1   : > { %v1549_v21 = vadd.f32 1e-12, %v1548_v20 }
0x10d3   : > { %2075 = vrsqrt.f32 %v1549_v21  ;;  %vm1556_vm4 = vweird.f32 %v1549_v21 }
0x10d9   : > { %v2076_v22 = vpop.eup %2075 }
0x10da   : > { %v1551_v23 = vmul.f32 %v2076_v22, %v1549_v21  ;;  %vm1557_vm3 = vweird.f32 %v2076_v22 }
0x10db   : > { %vm1558_vm5 = vmor %vm1556_vm4, %vm1557_vm3 }
0x10dc   : > { %v1552_v24 = vmul.f32 %v2076_v22, %v1551_v23 }
0x10de   : > { %v1553_v25 = vmul.f32 0.5, %v1552_v24 }
0x10e0   : > { %v1554_v26 = vsub.f32 1.5, %v1553_v25 }
0x10e2   : > { %v1555_v27 = vmul.f32 %v2076_v22, %v1554_v26 }
0x10e4   : > { %v1559_v29 = vsel %vm1558_vm5, %v2076_v22, %v1555_v27 }
0x10e5   : > { %v1560_v30 = vmul.f32 %v1559_v29, %v1543_v3 }
0x10e7   : > { %v1564_v31 = vmul.f32 %v2042_v28, %v1560_v30 }
0x10e9   : > { %v1568_v32 = vadd.f32 %v2043_v8, %v1564_v31 }
0x10eb   : > { %v1573_v33 = vpack.c.bf16 %v1568_v32, %v1568_v32 }
0x10ed   : > { %1962 = vmatmul.msk.bf16.vlgmr.msrb.gmra.mxu0 %vm431_vm0, %v1573_v33 }
0x116a   : > { %v1602_v34 = vpop.f32.mrf.mxu0 }
0x116b   : > { %v1603_v35 = vadd.f32 %v2044_v9, %v1602_v34 }
0x116d   : > { %1606 = vst [vmem:[%s425_s30] sm:$0xff] %v1603_v35 }
0x1172   : > { %v1604_v36 = vpop.f32.mrf.mxu0 }
0x1173 PF: > { %s22_s21 = sadd.s32 1, %s2083_s21  }
0x1174   : > { %p19_p4 = scmp.ge.s32.totalorder %s22_s21, 4  }
0x1176   :  { %21 = sbr.rel (!%p19_p4) target bundleno = 1 (0x1), region = 141 }

</bundles_post_ra>
